<compile_context>
chip_gen: v7x
topology: tpu7x:2x2x1
jax: 0.10.0
libtpu: 0.0.40
codegen_flags: <defaults>
</compile_context>

<pallas_src>
import math

import jax
import jax.numpy as jnp
from jax.experimental import pallas as pl
from jax.experimental.pallas import tpu as pltpu


# ----------------------------- model hyper-parameters -----------------------------
B = 2        # batch
T = 8        # sequence length
V = 32       # vocab size (embedding done as plain-JAX glue)
E = 32       # embedding dim
H = 32       # hidden size
C = 4        # num classes


def classifier_kernel(x_ref, len_ref, w_ih_ref, w_hh_ref, b_gi_ref, b_hn_ref,
                      w_dec_ref, b_dec_ref, logits_ref, energy_ref):
    """Forward pass: GRU encoder -> scaled-dot attention -> linear decoder.

    x_ref      : [T*B, E]  f32  embedded inputs, time-major rows (row t*B+b)
    len_ref    : [B, 1]    i32  true sequence lengths
    w_ih_ref   : [3, E, H] f32  GRU input weights, one block per gate (r, z, n)
    w_hh_ref   : [3, H, H] f32  GRU hidden weights per gate (r, z, n)
    b_gi_ref   : [3, 1, H] f32  input-side bias per gate; r,z include b_hh (they fuse),
                                n carries only b_ih_n (b_hh_n must stay inside r*(.))
    b_hn_ref   : [1, H]    f32  hidden-side bias of the n gate
    w_dec_ref  : [H, C]    f32  decoder Linear weight (transposed)
    b_dec_ref  : [1, C]    f32
    logits_ref : [B, C]    f32  output
    energy_ref : [B, T]    f32  output (softmaxed attention weights, lane-major)
    """
    lengths = len_ref[...]                                       # [B, 1] int32

    # ---- hoisted input projection: one batched matmul per gate over all T*B rows ----
    x_all = x_ref[...]                                           # [T*B, E]
    gi_r = jnp.dot(x_all, w_ih_ref[0], preferred_element_type=jnp.float32) + b_gi_ref[0]
    gi_z = jnp.dot(x_all, w_ih_ref[1], preferred_element_type=jnp.float32) + b_gi_ref[1]
    gi_n = jnp.dot(x_all, w_ih_ref[2], preferred_element_type=jnp.float32) + b_gi_ref[2]

    # ---- hoisted loop-invariant loads / broadcasts ----
    w_hh_r = w_hh_ref[0]
    w_hh_z = w_hh_ref[1]
    w_hh_n = w_hh_ref[2]
    b_hn = jnp.broadcast_to(b_hn_ref[...], (B, H))               # [B, H], broadcast once

    # ---- GRU recurrence: only the h @ W_hh matmuls remain on the serial path ----
    h = jnp.zeros((B, H), dtype=jnp.float32)
    outs = []
    for t in range(T):
        lo = t * B
        gh_r = jnp.dot(h, w_hh_r, preferred_element_type=jnp.float32)
        gh_z = jnp.dot(h, w_hh_z, preferred_element_type=jnp.float32)
        gh_n = jnp.dot(h, w_hh_n, preferred_element_type=jnp.float32) + b_hn
        r = jax.nn.sigmoid(gi_r[lo:lo + B] + gh_r)
        z = jax.nn.sigmoid(gi_z[lo:lo + B] + gh_z)
        n = jnp.tanh(gi_n[lo:lo + B] + r * gh_n)
        h_new = (1.0 - z) * n + z * h

        valid = lengths > t                                      # [B, 1] bool
        # pack_padded_sequence emulation: hidden frozen / outputs zeroed past length.
        h = jnp.where(valid, h_new, h)
        outs.append(jnp.where(valid, h_new, jnp.zeros_like(h_new)))

    # Encoder outputs kept in vregs (no VMEM scratch round-trip): [B, T, H].
    enc = jnp.stack(outs, axis=1)
    hidden = h                                                   # [B, H] last valid hidden

    # ---- scaled dot-product attention (lane-major [B, T] energies) ----
    scale = 1.0 / math.sqrt(H)
    e_bt = jnp.sum(enc * hidden[:, None, :], axis=-1) * scale    # [B, T]
    # NOTE: matching the PyTorch module, padded (zeroed) positions are NOT masked to
    # -inf before the softmax; they receive exp(0 - m) weight, exactly as the reference.
    m = jnp.max(e_bt, axis=-1, keepdims=True)
    p = jnp.exp(e_bt - m)
    attn_bt = p / jnp.sum(p, axis=-1, keepdims=True)             # softmax over T

    lin_comb = jnp.sum(enc * attn_bt[:, :, None], axis=1)        # [B, H]

    # ---- decoder Linear ----
    logits_ref[...] = (jnp.dot(lin_comb, w_dec_ref[...],
                               preferred_element_type=jnp.float32) + b_dec_ref[...])
    energy_ref[...] = attn_bt


def classifier_forward(x, params):
    """x = {'input': int32 [B, T] token ids, 'input_length': int32 [B]}."""
    input_ids = x['input']
    input_length = x['input_length']

    # plain-JAX glue: embedding lookup + time-major flatten for the hoisted projection
    x_emb = params['embedding'][input_ids]                        # [B, T, E]
    x_tbe = jnp.transpose(x_emb, (1, 0, 2)).astype(jnp.float32)   # [T, B, E]
    x_flat = x_tbe.reshape(T * B, E)                              # row t*B+b
    lengths_2d = input_length.astype(jnp.int32).reshape(B, 1)     # [B, 1]

    # one-time parameter re-layout (gate order r|z|n), plain-JAX glue
    w_ih_g = params['w_ih'].reshape(E, 3, H).transpose(1, 0, 2)   # [3, E, H]
    w_hh_g = params['w_hh'].reshape(H, 3, H).transpose(1, 0, 2)   # [3, H, H]
    b_ih_g = params['b_ih'].reshape(3, 1, H)
    b_hh_g = params['b_hh'].reshape(3, 1, H)
    # r,z gates: b_ih + b_hh fuse; n gate: only b_ih here, b_hh_n stays inside r*(.)
    b_gi = jnp.concatenate([b_ih_g[0:2] + b_hh_g[0:2], b_ih_g[2:3]], axis=0)  # [3,1,H]
    b_hn = b_hh_g[2]                                              # [1, H]

    vmem = pl.BlockSpec(memory_space=pltpu.MemorySpace.VMEM)
    # Gridless: everything fits in VMEM/vregs at these toy shapes. For realistic batch
    # sizes, add a leading batch grid axis with dimension_semantics=("parallel",) so
    # v7x's second TensorCore participates.
    logits, energy_bt = pl.pallas_call(
        classifier_kernel,
        out_shape=(
            jax.ShapeDtypeStruct((B, C), jnp.float32),
            jax.ShapeDtypeStruct((B, T), jnp.float32),
        ),
        in_specs=[vmem] * 8,
        out_specs=(vmem, vmem),
    )(x_flat, lengths_2d, w_ih_g, w_hh_g, b_gi, b_hn,
      params['w_dec'], params['b_dec'])

    # PyTorch attention returns energy as [B, 1, T] (bmm of [B,1,H] x [B,H,T])
    energy = energy_bt.reshape(B, 1, T)
    return logits, energy


# ----------------------------- pure-JAX reference -----------------------------
def classifier_reference(x, params):
    input_ids = x['input']
    lengths = x['input_length'].astype(jnp.int32)
    x_emb = params['embedding'][input_ids]                        # [B, T, E]
    x_tbe = jnp.transpose(x_emb, (1, 0, 2)).astype(jnp.float32)

    h = jnp.zeros((B, H), dtype=jnp.float32)
    enc = []
    for t in range(T):
        gi = x_tbe[t] @ params['w_ih'] + params['b_ih']
        gh = h @ params['w_hh'] + params['b_hh']
        r = jax.nn.sigmoid(gi[:, :H] + gh[:, :H])
        z = jax.nn.sigmoid(gi[:, H:2 * H] + gh[:, H:2 * H])
        n = jnp.tanh(gi[:, 2 * H:] + r * gh[:, 2 * H:])
        h_new = (1.0 - z) * n + z * h
        valid = (lengths > t).reshape(B, 1)
        h = jnp.where(valid, h_new, h)
        enc.append(jnp.where(valid, h_new, jnp.zeros_like(h_new)))
    enc = jnp.stack(enc, axis=0)                                  # [T, B, H]

    scale = 1.0 / math.sqrt(H)
    e_tb = jnp.sum(h[None, :, :] * enc, axis=-1) * scale
    attn_tb = jax.nn.softmax(e_tb, axis=0)
    lin = jnp.sum(attn_tb[:, :, None] * enc, axis=0)
    logits = lin @ params['w_dec'] + params['b_dec']
    energy = jnp.transpose(attn_tb, (1, 0)).reshape(B, 1, T)
    return logits, energy


# ----------------------------- deterministic parameters -----------------------------
def make_params(key):
    ks = jax.random.split(key, 8)
    bound = 1.0 / math.sqrt(H)
    uni = lambda k, shape, b: jax.random.uniform(k, shape, jnp.float32, -b, b)
    return {
        'embedding': jax.random.normal(ks[0], (V, E), jnp.float32) * 0.1,
        'w_ih':  uni(ks[1], (E, 3 * H), bound),   # GRU weight_ih_l0^T (gates r|z|n)
        'w_hh':  uni(ks[2], (H, 3 * H), bound),   # GRU weight_hh_l0^T
        'b_ih':  uni(ks[3], (1, 3 * H), bound),
        'b_hh':  uni(ks[4], (1, 3 * H), bound),
        'w_dec': uni(ks[5], (H, C), bound),       # Linear weight^T
        'b_dec': uni(ks[6], (1, C), bound),
    }


if __name__ == "__main__":
    key = jax.random.PRNGKey(0)
    k_params, k_ids = jax.random.split(key)
    params = make_params(k_params)

    input_ids = jax.random.randint(k_ids, (B, T), 0, V, dtype=jnp.int32)
    input_length = jnp.array([T, T - 3], dtype=jnp.int32)
    x = {'input': input_ids, 'input_length': input_length}

    logits, energy = classifier_forward(x, params)
    logits, energy = jax.block_until_ready((logits, energy))

    ref_logits, ref_energy = classifier_reference(x, params)
    assert logits.shape == (B, C) and energy.shape == (B, 1, T)
    assert jnp.allclose(logits, ref_logits, atol=1e-5), "logits mismatch"
    assert jnp.allclose(energy, ref_energy, atol=1e-5), "energy mismatch"

    print("KERNEL_OK")
</pallas_src>

<mosaic_0001>
module attributes {stable_mosaic.version = 11 : i64} {
  func.func @classifier_kernel(%arg0: memref<16x32xf32, #tpu.memory_space<vmem>>, %arg1: memref<2x1xi32, #tpu.memory_space<vmem>>, %arg2: memref<3x32x32xf32, #tpu.memory_space<vmem>>, %arg3: memref<3x32x32xf32, #tpu.memory_space<vmem>>, %arg4: memref<3x1x32xf32, #tpu.memory_space<vmem>>, %arg5: memref<1x32xf32, #tpu.memory_space<vmem>>, %arg6: memref<32x4xf32, #tpu.memory_space<vmem>>, %arg7: memref<1x4xf32, #tpu.memory_space<vmem>>, %arg8: memref<2x4xf32, #tpu.memory_space<vmem>>, %arg9: memref<2x8xf32, #tpu.memory_space<vmem>>) attributes {dimension_semantics = [], scalar_prefetch = 0 : i64, scratch_operands = 0 : i64, tpu.core_type = #tpu.core_type<tc>} {
    %c0 = arith.constant 0 : index
    %c0_0 = arith.constant 0 : index
    %0 = vector.load %arg1[%c0, %c0_0] : memref<2x1xi32, #tpu.memory_space<vmem>>, vector<2x1xi32>
    %c0_1 = arith.constant 0 : index
    %c0_2 = arith.constant 0 : index
    %1 = vector.load %arg0[%c0_1, %c0_2] : memref<16x32xf32, #tpu.memory_space<vmem>>, vector<16x32xf32>
    %c0_3 = arith.constant 0 : index
    %c0_4 = arith.constant 0 : index
    %c0_5 = arith.constant 0 : index
    %2 = vector.load %arg2[%c0_3, %c0_4, %c0_5] : memref<3x32x32xf32, #tpu.memory_space<vmem>>, vector<1x32x32xf32>
    %3 = vector.shape_cast %2 : vector<1x32x32xf32> to vector<32x32xf32>
    %cst = arith.constant dense<0.000000e+00> : vector<16x32xf32>
    %4 = tpu.matmul %1, %3, %cst {dimension_numbers = #tpu.dot_dimension_numbers<[1], [0], [0], [1], [0, 0, 1, 1], [], []>} : vector<16x32xf32>, vector<32x32xf32>, vector<16x32xf32> -> vector<16x32xf32>
    %c0_6 = arith.constant 0 : index
    %c0_7 = arith.constant 0 : index
    %c0_8 = arith.constant 0 : index
    %5 = vector.load %arg4[%c0_6, %c0_7, %c0_8] : memref<3x1x32xf32, #tpu.memory_space<vmem>>, vector<1x1x32xf32>
    %6 = vector.shape_cast %5 : vector<1x1x32xf32> to vector<1x32xf32>
    %7 = vector.broadcast %6 : vector<1x32xf32> to vector<16x32xf32>
    %8 = arith.addf %4, %7 : vector<16x32xf32>
    %c1 = arith.constant 1 : index
    %c0_9 = arith.constant 0 : index
    %c0_10 = arith.constant 0 : index
    %9 = vector.load %arg2[%c1, %c0_9, %c0_10] : memref<3x32x32xf32, #tpu.memory_space<vmem>>, vector<1x32x32xf32>
    %10 = vector.shape_cast %9 : vector<1x32x32xf32> to vector<32x32xf32>
    %cst_11 = arith.constant dense<0.000000e+00> : vector<16x32xf32>
    %11 = tpu.matmul %1, %10, %cst_11 {dimension_numbers = #tpu.dot_dimension_numbers<[1], [0], [0], [1], [0, 0, 1, 1], [], []>} : vector<16x32xf32>, vector<32x32xf32>, vector<16x32xf32> -> vector<16x32xf32>
    %c1_12 = arith.constant 1 : index
    %c0_13 = arith.constant 0 : index
    %c0_14 = arith.constant 0 : index
    %12 = vector.load %arg4[%c1_12, %c0_13, %c0_14] : memref<3x1x32xf32, #tpu.memory_space<vmem>>, vector<1x1x32xf32>
    %13 = vector.shape_cast %12 : vector<1x1x32xf32> to vector<1x32xf32>
    %14 = vector.broadcast %13 : vector<1x32xf32> to vector<16x32xf32>
    %15 = arith.addf %11, %14 : vector<16x32xf32>
    %c2 = arith.constant 2 : index
    %c0_15 = arith.constant 0 : index
    %c0_16 = arith.constant 0 : index
    %16 = vector.load %arg2[%c2, %c0_15, %c0_16] : memref<3x32x32xf32, #tpu.memory_space<vmem>>, vector<1x32x32xf32>
    %17 = vector.shape_cast %16 : vector<1x32x32xf32> to vector<32x32xf32>
    %cst_17 = arith.constant dense<0.000000e+00> : vector<16x32xf32>
    %18 = tpu.matmul %1, %17, %cst_17 {dimension_numbers = #tpu.dot_dimension_numbers<[1], [0], [0], [1], [0, 0, 1, 1], [], []>} : vector<16x32xf32>, vector<32x32xf32>, vector<16x32xf32> -> vector<16x32xf32>
    %c2_18 = arith.constant 2 : index
    %c0_19 = arith.constant 0 : index
    %c0_20 = arith.constant 0 : index
    %19 = vector.load %arg4[%c2_18, %c0_19, %c0_20] : memref<3x1x32xf32, #tpu.memory_space<vmem>>, vector<1x1x32xf32>
    %20 = vector.shape_cast %19 : vector<1x1x32xf32> to vector<1x32xf32>
    %21 = vector.broadcast %20 : vector<1x32xf32> to vector<16x32xf32>
    %22 = arith.addf %18, %21 : vector<16x32xf32>
    %c0_21 = arith.constant 0 : index
    %c0_22 = arith.constant 0 : index
    %c0_23 = arith.constant 0 : index
    %23 = vector.load %arg3[%c0_21, %c0_22, %c0_23] : memref<3x32x32xf32, #tpu.memory_space<vmem>>, vector<1x32x32xf32>
    %24 = vector.shape_cast %23 : vector<1x32x32xf32> to vector<32x32xf32>
    %c1_24 = arith.constant 1 : index
    %c0_25 = arith.constant 0 : index
    %c0_26 = arith.constant 0 : index
    %25 = vector.load %arg3[%c1_24, %c0_25, %c0_26] : memref<3x32x32xf32, #tpu.memory_space<vmem>>, vector<1x32x32xf32>
    %26 = vector.shape_cast %25 : vector<1x32x32xf32> to vector<32x32xf32>
    %c2_27 = arith.constant 2 : index
    %c0_28 = arith.constant 0 : index
    %c0_29 = arith.constant 0 : index
    %27 = vector.load %arg3[%c2_27, %c0_28, %c0_29] : memref<3x32x32xf32, #tpu.memory_space<vmem>>, vector<1x32x32xf32>
    %28 = vector.shape_cast %27 : vector<1x32x32xf32> to vector<32x32xf32>
    %c0_30 = arith.constant 0 : index
    %c0_31 = arith.constant 0 : index
    %29 = vector.load %arg5[%c0_30, %c0_31] : memref<1x32xf32, #tpu.memory_space<vmem>>, vector<1x32xf32>
    %30 = vector.shape_cast %29 : vector<1x32xf32> to vector<1x32xf32>
    %31 = vector.broadcast %30 : vector<1x32xf32> to vector<2x32xf32>
    %cst_32 = arith.constant 0.000000e+00 : f32
    %32 = vector.broadcast %cst_32 : f32 to vector<2x32xf32>
    %cst_33 = arith.constant dense<0.000000e+00> : vector<2x32xf32>
    %33 = tpu.matmul %32, %24, %cst_33 {dimension_numbers = #tpu.dot_dimension_numbers<[1], [0], [0], [1], [0, 0, 1, 1], [], []>} : vector<2x32xf32>, vector<32x32xf32>, vector<2x32xf32> -> vector<2x32xf32>
    %cst_34 = arith.constant dense<0.000000e+00> : vector<2x32xf32>
    %34 = tpu.matmul %32, %26, %cst_34 {dimension_numbers = #tpu.dot_dimension_numbers<[1], [0], [0], [1], [0, 0, 1, 1], [], []>} : vector<2x32xf32>, vector<32x32xf32>, vector<2x32xf32> -> vector<2x32xf32>
    %cst_35 = arith.constant dense<0.000000e+00> : vector<2x32xf32>
    %35 = tpu.matmul %32, %28, %cst_35 {dimension_numbers = #tpu.dot_dimension_numbers<[1], [0], [0], [1], [0, 0, 1, 1], [], []>} : vector<2x32xf32>, vector<32x32xf32>, vector<2x32xf32> -> vector<2x32xf32>
    %36 = arith.addf %35, %31 : vector<2x32xf32>
    %37 = vector.extract_strided_slice %8 {offsets = [0, 0], sizes = [2, 32], strides = [1, 1]} : vector<16x32xf32> to vector<2x32xf32>
    %38 = arith.addf %37, %33 : vector<2x32xf32>
    %39 = arith.negf %38 : vector<2x32xf32>
    %40 = math.exp %39 : vector<2x32xf32>
    %cst_36 = arith.constant 1.000000e+00 : f32
    %41 = vector.broadcast %cst_36 : f32 to vector<2x32xf32>
    %42 = arith.addf %41, %40 : vector<2x32xf32>
    %43 = arith.divf %41, %42 : vector<2x32xf32>
    %44 = vector.extract_strided_slice %15 {offsets = [0, 0], sizes = [2, 32], strides = [1, 1]} : vector<16x32xf32> to vector<2x32xf32>
    %45 = arith.addf %44, %34 : vector<2x32xf32>
    %46 = arith.negf %45 : vector<2x32xf32>
    %47 = math.exp %46 : vector<2x32xf32>
    %cst_37 = arith.constant 1.000000e+00 : f32
    %48 = vector.broadcast %cst_37 : f32 to vector<2x32xf32>
    %49 = arith.addf %48, %47 : vector<2x32xf32>
    %50 = arith.divf %48, %49 : vector<2x32xf32>
    %51 = vector.extract_strided_slice %22 {offsets = [0, 0], sizes = [2, 32], strides = [1, 1]} : vector<16x32xf32> to vector<2x32xf32>
    %52 = arith.mulf %43, %36 : vector<2x32xf32>
    %53 = arith.addf %51, %52 : vector<2x32xf32>
    %54 = math.tanh %53 : vector<2x32xf32>
    %cst_38 = arith.constant 1.000000e+00 : f32
    %55 = vector.broadcast %cst_38 : f32 to vector<2x32xf32>
    %56 = arith.subf %55, %50 : vector<2x32xf32>
    %57 = arith.mulf %56, %54 : vector<2x32xf32>
    %58 = arith.mulf %50, %32 : vector<2x32xf32>
    %59 = arith.addf %57, %58 : vector<2x32xf32>
    %c0_i32 = arith.constant 0 : i32
    %60 = vector.broadcast %c0_i32 : i32 to vector<2x1xi32>
    %61 = arith.cmpi sgt, %0, %60 : vector<2x1xi32>
    %62 = vector.shape_cast %61 : vector<2x1xi1> to vector<2x1xi1>
    %63 = vector.broadcast %62 : vector<2x1xi1> to vector<2x32xi1>
    %64 = arith.select %63, %59, %32 : vector<2x32xi1>, vector<2x32xf32>
    %cst_39 = arith.constant 0.000000e+00 : f32
    %65 = vector.broadcast %cst_39 : f32 to vector<2x32xf32>
    %66 = vector.shape_cast %61 : vector<2x1xi1> to vector<2x1xi1>
    %67 = vector.broadcast %66 : vector<2x1xi1> to vector<2x32xi1>
    %68 = arith.select %67, %59, %65 : vector<2x32xi1>, vector<2x32xf32>
    %cst_40 = arith.constant dense<0.000000e+00> : vector<2x32xf32>
    %69 = tpu.matmul %64, %24, %cst_40 {dimension_numbers = #tpu.dot_dimension_numbers<[1], [0], [0], [1], [0, 0, 1, 1], [], []>} : vector<2x32xf32>, vector<32x32xf32>, vector<2x32xf32> -> vector<2x32xf32>
    %cst_41 = arith.constant dense<0.000000e+00> : vector<2x32xf32>
    %70 = tpu.matmul %64, %26, %cst_41 {dimension_numbers = #tpu.dot_dimension_numbers<[1], [0], [0], [1], [0, 0, 1, 1], [], []>} : vector<2x32xf32>, vector<32x32xf32>, vector<2x32xf32> -> vector<2x32xf32>
    %cst_42 = arith.constant dense<0.000000e+00> : vector<2x32xf32>
    %71 = tpu.matmul %64, %28, %cst_42 {dimension_numbers = #tpu.dot_dimension_numbers<[1], [0], [0], [1], [0, 0, 1, 1], [], []>} : vector<2x32xf32>, vector<32x32xf32>, vector<2x32xf32> -> vector<2x32xf32>
    %72 = arith.addf %71, %31 : vector<2x32xf32>
    %73 = vector.extract_strided_slice %8 {offsets = [2, 0], sizes = [2, 32], strides = [1, 1]} : vector<16x32xf32> to vector<2x32xf32>
    %74 = arith.addf %73, %69 : vector<2x32xf32>
    %75 = arith.negf %74 : vector<2x32xf32>
    %76 = math.exp %75 : vector<2x32xf32>
    %cst_43 = arith.constant 1.000000e+00 : f32
    %77 = vector.broadcast %cst_43 : f32 to vector<2x32xf32>
    %78 = arith.addf %77, %76 : vector<2x32xf32>
    %79 = arith.divf %77, %78 : vector<2x32xf32>
    %80 = vector.extract_strided_slice %15 {offsets = [2, 0], sizes = [2, 32], strides = [1, 1]} : vector<16x32xf32> to vector<2x32xf32>
    %81 = arith.addf %80, %70 : vector<2x32xf32>
    %82 = arith.negf %81 : vector<2x32xf32>
    %83 = math.exp %82 : vector<2x32xf32>
    %cst_44 = arith.constant 1.000000e+00 : f32
    %84 = vector.broadcast %cst_44 : f32 to vector<2x32xf32>
    %85 = arith.addf %84, %83 : vector<2x32xf32>
    %86 = arith.divf %84, %85 : vector<2x32xf32>
    %87 = vector.extract_strided_slice %22 {offsets = [2, 0], sizes = [2, 32], strides = [1, 1]} : vector<16x32xf32> to vector<2x32xf32>
    %88 = arith.mulf %79, %72 : vector<2x32xf32>
    %89 = arith.addf %87, %88 : vector<2x32xf32>
    %90 = math.tanh %89 : vector<2x32xf32>
    %cst_45 = arith.constant 1.000000e+00 : f32
    %91 = vector.broadcast %cst_45 : f32 to vector<2x32xf32>
    %92 = arith.subf %91, %86 : vector<2x32xf32>
    %93 = arith.mulf %92, %90 : vector<2x32xf32>
    %94 = arith.mulf %86, %64 : vector<2x32xf32>
    %95 = arith.addf %93, %94 : vector<2x32xf32>
    %c1_i32 = arith.constant 1 : i32
    %96 = vector.broadcast %c1_i32 : i32 to vector<2x1xi32>
    %97 = arith.cmpi sgt, %0, %96 : vector<2x1xi32>
    %98 = vector.shape_cast %97 : vector<2x1xi1> to vector<2x1xi1>
    %99 = vector.broadcast %98 : vector<2x1xi1> to vector<2x32xi1>
    %100 = arith.select %99, %95, %64 : vector<2x32xi1>, vector<2x32xf32>
    %cst_46 = arith.constant 0.000000e+00 : f32
    %101 = vector.broadcast %cst_46 : f32 to vector<2x32xf32>
    %102 = vector.shape_cast %97 : vector<2x1xi1> to vector<2x1xi1>
    %103 = vector.broadcast %102 : vector<2x1xi1> to vector<2x32xi1>
    %104 = arith.select %103, %95, %101 : vector<2x32xi1>, vector<2x32xf32>
    %cst_47 = arith.constant dense<0.000000e+00> : vector<2x32xf32>
    %105 = tpu.matmul %100, %24, %cst_47 {dimension_numbers = #tpu.dot_dimension_numbers<[1], [0], [0], [1], [0, 0, 1, 1], [], []>} : vector<2x32xf32>, vector<32x32xf32>, vector<2x32xf32> -> vector<2x32xf32>
    %cst_48 = arith.constant dense<0.000000e+00> : vector<2x32xf32>
    %106 = tpu.matmul %100, %26, %cst_48 {dimension_numbers = #tpu.dot_dimension_numbers<[1], [0], [0], [1], [0, 0, 1, 1], [], []>} : vector<2x32xf32>, vector<32x32xf32>, vector<2x32xf32> -> vector<2x32xf32>
    %cst_49 = arith.constant dense<0.000000e+00> : vector<2x32xf32>
    %107 = tpu.matmul %100, %28, %cst_49 {dimension_numbers = #tpu.dot_dimension_numbers<[1], [0], [0], [1], [0, 0, 1, 1], [], []>} : vector<2x32xf32>, vector<32x32xf32>, vector<2x32xf32> -> vector<2x32xf32>
    %108 = arith.addf %107, %31 : vector<2x32xf32>
    %109 = vector.extract_strided_slice %8 {offsets = [4, 0], sizes = [2, 32], strides = [1, 1]} : vector<16x32xf32> to vector<2x32xf32>
    %110 = arith.addf %109, %105 : vector<2x32xf32>
    %111 = arith.negf %110 : vector<2x32xf32>
    %112 = math.exp %111 : vector<2x32xf32>
    %cst_50 = arith.constant 1.000000e+00 : f32
    %113 = vector.broadcast %cst_50 : f32 to vector<2x32xf32>
    %114 = arith.addf %113, %112 : vector<2x32xf32>
    %115 = arith.divf %113, %114 : vector<2x32xf32>
    %116 = vector.extract_strided_slice %15 {offsets = [4, 0], sizes = [2, 32], strides = [1, 1]} : vector<16x32xf32> to vector<2x32xf32>
    %117 = arith.addf %116, %106 : vector<2x32xf32>
    %118 = arith.negf %117 : vector<2x32xf32>
    %119 = math.exp %118 : vector<2x32xf32>
    %cst_51 = arith.constant 1.000000e+00 : f32
    %120 = vector.broadcast %cst_51 : f32 to vector<2x32xf32>
    %121 = arith.addf %120, %119 : vector<2x32xf32>
    %122 = arith.divf %120, %121 : vector<2x32xf32>
    %123 = vector.extract_strided_slice %22 {offsets = [4, 0], sizes = [2, 32], strides = [1, 1]} : vector<16x32xf32> to vector<2x32xf32>
    %124 = arith.mulf %115, %108 : vector<2x32xf32>
    %125 = arith.addf %123, %124 : vector<2x32xf32>
    %126 = math.tanh %125 : vector<2x32xf32>
    %cst_52 = arith.constant 1.000000e+00 : f32
    %127 = vector.broadcast %cst_52 : f32 to vector<2x32xf32>
    %128 = arith.subf %127, %122 : vector<2x32xf32>
    %129 = arith.mulf %128, %126 : vector<2x32xf32>
    %130 = arith.mulf %122, %100 : vector<2x32xf32>
    %131 = arith.addf %129, %130 : vector<2x32xf32>
    %c2_i32 = arith.constant 2 : i32
    %132 = vector.broadcast %c2_i32 : i32 to vector<2x1xi32>
    %133 = arith.cmpi sgt, %0, %132 : vector<2x1xi32>
    %134 = vector.shape_cast %133 : vector<2x1xi1> to vector<2x1xi1>
    %135 = vector.broadcast %134 : vector<2x1xi1> to vector<2x32xi1>
    %136 = arith.select %135, %131, %100 : vector<2x32xi1>, vector<2x32xf32>
    %cst_53 = arith.constant 0.000000e+00 : f32
    %137 = vector.broadcast %cst_53 : f32 to vector<2x32xf32>
    %138 = vector.shape_cast %133 : vector<2x1xi1> to vector<2x1xi1>
    %139 = vector.broadcast %138 : vector<2x1xi1> to vector<2x32xi1>
    %140 = arith.select %139, %131, %137 : vector<2x32xi1>, vector<2x32xf32>
    %cst_54 = arith.constant dense<0.000000e+00> : vector<2x32xf32>
    %141 = tpu.matmul %136, %24, %cst_54 {dimension_numbers = #tpu.dot_dimension_numbers<[1], [0], [0], [1], [0, 0, 1, 1], [], []>} : vector<2x32xf32>, vector<32x32xf32>, vector<2x32xf32> -> vector<2x32xf32>
    %cst_55 = arith.constant dense<0.000000e+00> : vector<2x32xf32>
    %142 = tpu.matmul %136, %26, %cst_55 {dimension_numbers = #tpu.dot_dimension_numbers<[1], [0], [0], [1], [0, 0, 1, 1], [], []>} : vector<2x32xf32>, vector<32x32xf32>, vector<2x32xf32> -> vector<2x32xf32>
    %cst_56 = arith.constant dense<0.000000e+00> : vector<2x32xf32>
    %143 = tpu.matmul %136, %28, %cst_56 {dimension_numbers = #tpu.dot_dimension_numbers<[1], [0], [0], [1], [0, 0, 1, 1], [], []>} : vector<2x32xf32>, vector<32x32xf32>, vector<2x32xf32> -> vector<2x32xf32>
    %144 = arith.addf %143, %31 : vector<2x32xf32>
    %145 = vector.extract_strided_slice %8 {offsets = [6, 0], sizes = [2, 32], strides = [1, 1]} : vector<16x32xf32> to vector<2x32xf32>
    %146 = arith.addf %145, %141 : vector<2x32xf32>
    %147 = arith.negf %146 : vector<2x32xf32>
    %148 = math.exp %147 : vector<2x32xf32>
    %cst_57 = arith.constant 1.000000e+00 : f32
    %149 = vector.broadcast %cst_57 : f32 to vector<2x32xf32>
    %150 = arith.addf %149, %148 : vector<2x32xf32>
    %151 = arith.divf %149, %150 : vector<2x32xf32>
    %152 = vector.extract_strided_slice %15 {offsets = [6, 0], sizes = [2, 32], strides = [1, 1]} : vector<16x32xf32> to vector<2x32xf32>
    %153 = arith.addf %152, %142 : vector<2x32xf32>
    %154 = arith.negf %153 : vector<2x32xf32>
    %155 = math.exp %154 : vector<2x32xf32>
    %cst_58 = arith.constant 1.000000e+00 : f32
    %156 = vector.broadcast %cst_58 : f32 to vector<2x32xf32>
    %157 = arith.addf %156, %155 : vector<2x32xf32>
    %158 = arith.divf %156, %157 : vector<2x32xf32>
    %159 = vector.extract_strided_slice %22 {offsets = [6, 0], sizes = [2, 32], strides = [1, 1]} : vector<16x32xf32> to vector<2x32xf32>
    %160 = arith.mulf %151, %144 : vector<2x32xf32>
    %161 = arith.addf %159, %160 : vector<2x32xf32>
    %162 = math.tanh %161 : vector<2x32xf32>
    %cst_59 = arith.constant 1.000000e+00 : f32
    %163 = vector.broadcast %cst_59 : f32 to vector<2x32xf32>
    %164 = arith.subf %163, %158 : vector<2x32xf32>
    %165 = arith.mulf %164, %162 : vector<2x32xf32>
    %166 = arith.mulf %158, %136 : vector<2x32xf32>
    %167 = arith.addf %165, %166 : vector<2x32xf32>
    %c3_i32 = arith.constant 3 : i32
    %168 = vector.broadcast %c3_i32 : i32 to vector<2x1xi32>
    %169 = arith.cmpi sgt, %0, %168 : vector<2x1xi32>
    %170 = vector.shape_cast %169 : vector<2x1xi1> to vector<2x1xi1>
    %171 = vector.broadcast %170 : vector<2x1xi1> to vector<2x32xi1>
    %172 = arith.select %171, %167, %136 : vector<2x32xi1>, vector<2x32xf32>
    %cst_60 = arith.constant 0.000000e+00 : f32
    %173 = vector.broadcast %cst_60 : f32 to vector<2x32xf32>
    %174 = vector.shape_cast %169 : vector<2x1xi1> to vector<2x1xi1>
    %175 = vector.broadcast %174 : vector<2x1xi1> to vector<2x32xi1>
    %176 = arith.select %175, %167, %173 : vector<2x32xi1>, vector<2x32xf32>
    %cst_61 = arith.constant dense<0.000000e+00> : vector<2x32xf32>
    %177 = tpu.matmul %172, %24, %cst_61 {dimension_numbers = #tpu.dot_dimension_numbers<[1], [0], [0], [1], [0, 0, 1, 1], [], []>} : vector<2x32xf32>, vector<32x32xf32>, vector<2x32xf32> -> vector<2x32xf32>
    %cst_62 = arith.constant dense<0.000000e+00> : vector<2x32xf32>
    %178 = tpu.matmul %172, %26, %cst_62 {dimension_numbers = #tpu.dot_dimension_numbers<[1], [0], [0], [1], [0, 0, 1, 1], [], []>} : vector<2x32xf32>, vector<32x32xf32>, vector<2x32xf32> -> vector<2x32xf32>
    %cst_63 = arith.constant dense<0.000000e+00> : vector<2x32xf32>
    %179 = tpu.matmul %172, %28, %cst_63 {dimension_numbers = #tpu.dot_dimension_numbers<[1], [0], [0], [1], [0, 0, 1, 1], [], []>} : vector<2x32xf32>, vector<32x32xf32>, vector<2x32xf32> -> vector<2x32xf32>
    %180 = arith.addf %179, %31 : vector<2x32xf32>
    %181 = vector.extract_strided_slice %8 {offsets = [8, 0], sizes = [2, 32], strides = [1, 1]} : vector<16x32xf32> to vector<2x32xf32>
    %182 = arith.addf %181, %177 : vector<2x32xf32>
    %183 = arith.negf %182 : vector<2x32xf32>
    %184 = math.exp %183 : vector<2x32xf32>
    %cst_64 = arith.constant 1.000000e+00 : f32
    %185 = vector.broadcast %cst_64 : f32 to vector<2x32xf32>
    %186 = arith.addf %185, %184 : vector<2x32xf32>
    %187 = arith.divf %185, %186 : vector<2x32xf32>
    %188 = vector.extract_strided_slice %15 {offsets = [8, 0], sizes = [2, 32], strides = [1, 1]} : vector<16x32xf32> to vector<2x32xf32>
    %189 = arith.addf %188, %178 : vector<2x32xf32>
    %190 = arith.negf %189 : vector<2x32xf32>
    %191 = math.exp %190 : vector<2x32xf32>
    %cst_65 = arith.constant 1.000000e+00 : f32
    %192 = vector.broadcast %cst_65 : f32 to vector<2x32xf32>
    %193 = arith.addf %192, %191 : vector<2x32xf32>
    %194 = arith.divf %192, %193 : vector<2x32xf32>
    %195 = vector.extract_strided_slice %22 {offsets = [8, 0], sizes = [2, 32], strides = [1, 1]} : vector<16x32xf32> to vector<2x32xf32>
    %196 = arith.mulf %187, %180 : vector<2x32xf32>
    %197 = arith.addf %195, %196 : vector<2x32xf32>
    %198 = math.tanh %197 : vector<2x32xf32>
    %cst_66 = arith.constant 1.000000e+00 : f32
    %199 = vector.broadcast %cst_66 : f32 to vector<2x32xf32>
    %200 = arith.subf %199, %194 : vector<2x32xf32>
    %201 = arith.mulf %200, %198 : vector<2x32xf32>
    %202 = arith.mulf %194, %172 : vector<2x32xf32>
    %203 = arith.addf %201, %202 : vector<2x32xf32>
    %c4_i32 = arith.constant 4 : i32
    %204 = vector.broadcast %c4_i32 : i32 to vector<2x1xi32>
    %205 = arith.cmpi sgt, %0, %204 : vector<2x1xi32>
    %206 = vector.shape_cast %205 : vector<2x1xi1> to vector<2x1xi1>
    %207 = vector.broadcast %206 : vector<2x1xi1> to vector<2x32xi1>
    %208 = arith.select %207, %203, %172 : vector<2x32xi1>, vector<2x32xf32>
    %cst_67 = arith.constant 0.000000e+00 : f32
    %209 = vector.broadcast %cst_67 : f32 to vector<2x32xf32>
    %210 = vector.shape_cast %205 : vector<2x1xi1> to vector<2x1xi1>
    %211 = vector.broadcast %210 : vector<2x1xi1> to vector<2x32xi1>
    %212 = arith.select %211, %203, %209 : vector<2x32xi1>, vector<2x32xf32>
    %cst_68 = arith.constant dense<0.000000e+00> : vector<2x32xf32>
    %213 = tpu.matmul %208, %24, %cst_68 {dimension_numbers = #tpu.dot_dimension_numbers<[1], [0], [0], [1], [0, 0, 1, 1], [], []>} : vector<2x32xf32>, vector<32x32xf32>, vector<2x32xf32> -> vector<2x32xf32>
    %cst_69 = arith.constant dense<0.000000e+00> : vector<2x32xf32>
    %214 = tpu.matmul %208, %26, %cst_69 {dimension_numbers = #tpu.dot_dimension_numbers<[1], [0], [0], [1], [0, 0, 1, 1], [], []>} : vector<2x32xf32>, vector<32x32xf32>, vector<2x32xf32> -> vector<2x32xf32>
    %cst_70 = arith.constant dense<0.000000e+00> : vector<2x32xf32>
    %215 = tpu.matmul %208, %28, %cst_70 {dimension_numbers = #tpu.dot_dimension_numbers<[1], [0], [0], [1], [0, 0, 1, 1], [], []>} : vector<2x32xf32>, vector<32x32xf32>, vector<2x32xf32> -> vector<2x32xf32>
    %216 = arith.addf %215, %31 : vector<2x32xf32>
    %217 = vector.extract_strided_slice %8 {offsets = [10, 0], sizes = [2, 32], strides = [1, 1]} : vector<16x32xf32> to vector<2x32xf32>
    %218 = arith.addf %217, %213 : vector<2x32xf32>
    %219 = arith.negf %218 : vector<2x32xf32>
    %220 = math.exp %219 : vector<2x32xf32>
    %cst_71 = arith.constant 1.000000e+00 : f32
    %221 = vector.broadcast %cst_71 : f32 to vector<2x32xf32>
    %222 = arith.addf %221, %220 : vector<2x32xf32>
    %223 = arith.divf %221, %222 : vector<2x32xf32>
    %224 = vector.extract_strided_slice %15 {offsets = [10, 0], sizes = [2, 32], strides = [1, 1]} : vector<16x32xf32> to vector<2x32xf32>
    %225 = arith.addf %224, %214 : vector<2x32xf32>
    %226 = arith.negf %225 : vector<2x32xf32>
    %227 = math.exp %226 : vector<2x32xf32>
    %cst_72 = arith.constant 1.000000e+00 : f32
    %228 = vector.broadcast %cst_72 : f32 to vector<2x32xf32>
    %229 = arith.addf %228, %227 : vector<2x32xf32>
    %230 = arith.divf %228, %229 : vector<2x32xf32>
    %231 = vector.extract_strided_slice %22 {offsets = [10, 0], sizes = [2, 32], strides = [1, 1]} : vector<16x32xf32> to vector<2x32xf32>
    %232 = arith.mulf %223, %216 : vector<2x32xf32>
    %233 = arith.addf %231, %232 : vector<2x32xf32>
    %234 = math.tanh %233 : vector<2x32xf32>
    %cst_73 = arith.constant 1.000000e+00 : f32
    %235 = vector.broadcast %cst_73 : f32 to vector<2x32xf32>
    %236 = arith.subf %235, %230 : vector<2x32xf32>
    %237 = arith.mulf %236, %234 : vector<2x32xf32>
    %238 = arith.mulf %230, %208 : vector<2x32xf32>
    %239 = arith.addf %237, %238 : vector<2x32xf32>
    %c5_i32 = arith.constant 5 : i32
    %240 = vector.broadcast %c5_i32 : i32 to vector<2x1xi32>
    %241 = arith.cmpi sgt, %0, %240 : vector<2x1xi32>
    %242 = vector.shape_cast %241 : vector<2x1xi1> to vector<2x1xi1>
    %243 = vector.broadcast %242 : vector<2x1xi1> to vector<2x32xi1>
    %244 = arith.select %243, %239, %208 : vector<2x32xi1>, vector<2x32xf32>
    %cst_74 = arith.constant 0.000000e+00 : f32
    %245 = vector.broadcast %cst_74 : f32 to vector<2x32xf32>
    %246 = vector.shape_cast %241 : vector<2x1xi1> to vector<2x1xi1>
    %247 = vector.broadcast %246 : vector<2x1xi1> to vector<2x32xi1>
    %248 = arith.select %247, %239, %245 : vector<2x32xi1>, vector<2x32xf32>
    %cst_75 = arith.constant dense<0.000000e+00> : vector<2x32xf32>
    %249 = tpu.matmul %244, %24, %cst_75 {dimension_numbers = #tpu.dot_dimension_numbers<[1], [0], [0], [1], [0, 0, 1, 1], [], []>} : vector<2x32xf32>, vector<32x32xf32>, vector<2x32xf32> -> vector<2x32xf32>
    %cst_76 = arith.constant dense<0.000000e+00> : vector<2x32xf32>
    %250 = tpu.matmul %244, %26, %cst_76 {dimension_numbers = #tpu.dot_dimension_numbers<[1], [0], [0], [1], [0, 0, 1, 1], [], []>} : vector<2x32xf32>, vector<32x32xf32>, vector<2x32xf32> -> vector<2x32xf32>
    %cst_77 = arith.constant dense<0.000000e+00> : vector<2x32xf32>
    %251 = tpu.matmul %244, %28, %cst_77 {dimension_numbers = #tpu.dot_dimension_numbers<[1], [0], [0], [1], [0, 0, 1, 1], [], []>} : vector<2x32xf32>, vector<32x32xf32>, vector<2x32xf32> -> vector<2x32xf32>
    %252 = arith.addf %251, %31 : vector<2x32xf32>
    %253 = vector.extract_strided_slice %8 {offsets = [12, 0], sizes = [2, 32], strides = [1, 1]} : vector<16x32xf32> to vector<2x32xf32>
    %254 = arith.addf %253, %249 : vector<2x32xf32>
    %255 = arith.negf %254 : vector<2x32xf32>
    %256 = math.exp %255 : vector<2x32xf32>
    %cst_78 = arith.constant 1.000000e+00 : f32
    %257 = vector.broadcast %cst_78 : f32 to vector<2x32xf32>
    %258 = arith.addf %257, %256 : vector<2x32xf32>
    %259 = arith.divf %257, %258 : vector<2x32xf32>
    %260 = vector.extract_strided_slice %15 {offsets = [12, 0], sizes = [2, 32], strides = [1, 1]} : vector<16x32xf32> to vector<2x32xf32>
    %261 = arith.addf %260, %250 : vector<2x32xf32>
    %262 = arith.negf %261 : vector<2x32xf32>
    %263 = math.exp %262 : vector<2x32xf32>
    %cst_79 = arith.constant 1.000000e+00 : f32
    %264 = vector.broadcast %cst_79 : f32 to vector<2x32xf32>
    %265 = arith.addf %264, %263 : vector<2x32xf32>
    %266 = arith.divf %264, %265 : vector<2x32xf32>
    %267 = vector.extract_strided_slice %22 {offsets = [12, 0], sizes = [2, 32], strides = [1, 1]} : vector<16x32xf32> to vector<2x32xf32>
    %268 = arith.mulf %259, %252 : vector<2x32xf32>
    %269 = arith.addf %267, %268 : vector<2x32xf32>
    %270 = math.tanh %269 : vector<2x32xf32>
    %cst_80 = arith.constant 1.000000e+00 : f32
    %271 = vector.broadcast %cst_80 : f32 to vector<2x32xf32>
    %272 = arith.subf %271, %266 : vector<2x32xf32>
    %273 = arith.mulf %272, %270 : vector<2x32xf32>
    %274 = arith.mulf %266, %244 : vector<2x32xf32>
    %275 = arith.addf %273, %274 : vector<2x32xf32>
    %c6_i32 = arith.constant 6 : i32
    %276 = vector.broadcast %c6_i32 : i32 to vector<2x1xi32>
    %277 = arith.cmpi sgt, %0, %276 : vector<2x1xi32>
    %278 = vector.shape_cast %277 : vector<2x1xi1> to vector<2x1xi1>
    %279 = vector.broadcast %278 : vector<2x1xi1> to vector<2x32xi1>
    %280 = arith.select %279, %275, %244 : vector<2x32xi1>, vector<2x32xf32>
    %cst_81 = arith.constant 0.000000e+00 : f32
    %281 = vector.broadcast %cst_81 : f32 to vector<2x32xf32>
    %282 = vector.shape_cast %277 : vector<2x1xi1> to vector<2x1xi1>
    %283 = vector.broadcast %282 : vector<2x1xi1> to vector<2x32xi1>
    %284 = arith.select %283, %275, %281 : vector<2x32xi1>, vector<2x32xf32>
    %cst_82 = arith.constant dense<0.000000e+00> : vector<2x32xf32>
    %285 = tpu.matmul %280, %24, %cst_82 {dimension_numbers = #tpu.dot_dimension_numbers<[1], [0], [0], [1], [0, 0, 1, 1], [], []>} : vector<2x32xf32>, vector<32x32xf32>, vector<2x32xf32> -> vector<2x32xf32>
    %cst_83 = arith.constant dense<0.000000e+00> : vector<2x32xf32>
    %286 = tpu.matmul %280, %26, %cst_83 {dimension_numbers = #tpu.dot_dimension_numbers<[1], [0], [0], [1], [0, 0, 1, 1], [], []>} : vector<2x32xf32>, vector<32x32xf32>, vector<2x32xf32> -> vector<2x32xf32>
    %cst_84 = arith.constant dense<0.000000e+00> : vector<2x32xf32>
    %287 = tpu.matmul %280, %28, %cst_84 {dimension_numbers = #tpu.dot_dimension_numbers<[1], [0], [0], [1], [0, 0, 1, 1], [], []>} : vector<2x32xf32>, vector<32x32xf32>, vector<2x32xf32> -> vector<2x32xf32>
    %288 = arith.addf %287, %31 : vector<2x32xf32>
    %289 = vector.extract_strided_slice %8 {offsets = [14, 0], sizes = [2, 32], strides = [1, 1]} : vector<16x32xf32> to vector<2x32xf32>
    %290 = arith.addf %289, %285 : vector<2x32xf32>
    %291 = arith.negf %290 : vector<2x32xf32>
    %292 = math.exp %291 : vector<2x32xf32>
    %cst_85 = arith.constant 1.000000e+00 : f32
    %293 = vector.broadcast %cst_85 : f32 to vector<2x32xf32>
    %294 = arith.addf %293, %292 : vector<2x32xf32>
    %295 = arith.divf %293, %294 : vector<2x32xf32>
    %296 = vector.extract_strided_slice %15 {offsets = [14, 0], sizes = [2, 32], strides = [1, 1]} : vector<16x32xf32> to vector<2x32xf32>
    %297 = arith.addf %296, %286 : vector<2x32xf32>
    %298 = arith.negf %297 : vector<2x32xf32>
    %299 = math.exp %298 : vector<2x32xf32>
    %cst_86 = arith.constant 1.000000e+00 : f32
    %300 = vector.broadcast %cst_86 : f32 to vector<2x32xf32>
    %301 = arith.addf %300, %299 : vector<2x32xf32>
    %302 = arith.divf %300, %301 : vector<2x32xf32>
    %303 = vector.extract_strided_slice %22 {offsets = [14, 0], sizes = [2, 32], strides = [1, 1]} : vector<16x32xf32> to vector<2x32xf32>
    %304 = arith.mulf %295, %288 : vector<2x32xf32>
    %305 = arith.addf %303, %304 : vector<2x32xf32>
    %306 = math.tanh %305 : vector<2x32xf32>
    %cst_87 = arith.constant 1.000000e+00 : f32
    %307 = vector.broadcast %cst_87 : f32 to vector<2x32xf32>
    %308 = arith.subf %307, %302 : vector<2x32xf32>
    %309 = arith.mulf %308, %306 : vector<2x32xf32>
    %310 = arith.mulf %302, %280 : vector<2x32xf32>
    %311 = arith.addf %309, %310 : vector<2x32xf32>
    %c7_i32 = arith.constant 7 : i32
    %312 = vector.broadcast %c7_i32 : i32 to vector<2x1xi32>
    %313 = arith.cmpi sgt, %0, %312 : vector<2x1xi32>
    %314 = vector.shape_cast %313 : vector<2x1xi1> to vector<2x1xi1>
    %315 = vector.broadcast %314 : vector<2x1xi1> to vector<2x32xi1>
    %316 = arith.select %315, %311, %280 : vector<2x32xi1>, vector<2x32xf32>
    %cst_88 = arith.constant 0.000000e+00 : f32
    %317 = vector.broadcast %cst_88 : f32 to vector<2x32xf32>
    %318 = vector.shape_cast %313 : vector<2x1xi1> to vector<2x1xi1>
    %319 = vector.broadcast %318 : vector<2x1xi1> to vector<2x32xi1>
    %320 = arith.select %319, %311, %317 : vector<2x32xi1>, vector<2x32xf32>
    %321 = vector.shape_cast %68 : vector<2x32xf32> to vector<2x1x32xf32>
    %322 = vector.shape_cast %104 : vector<2x32xf32> to vector<2x1x32xf32>
    %323 = vector.shape_cast %140 : vector<2x32xf32> to vector<2x1x32xf32>
    %324 = vector.shape_cast %176 : vector<2x32xf32> to vector<2x1x32xf32>
    %325 = vector.shape_cast %212 : vector<2x32xf32> to vector<2x1x32xf32>
    %326 = vector.shape_cast %248 : vector<2x32xf32> to vector<2x1x32xf32>
    %327 = vector.shape_cast %284 : vector<2x32xf32> to vector<2x1x32xf32>
    %328 = vector.shape_cast %320 : vector<2x32xf32> to vector<2x1x32xf32>
    %329 = tpu.concatenate %321, %322, %323, %324, %325, %326, %327, %328 in 1 : vector<2x1x32xf32>, vector<2x1x32xf32>, vector<2x1x32xf32>, vector<2x1x32xf32>, vector<2x1x32xf32>, vector<2x1x32xf32>, vector<2x1x32xf32>, vector<2x1x32xf32> -> vector<2x8x32xf32>
    %330 = vector.shape_cast %316 : vector<2x32xf32> to vector<2x1x32xf32>
    %331 = vector.broadcast %330 : vector<2x1x32xf32> to vector<2x8x32xf32>
    %332 = arith.mulf %329, %331 : vector<2x8x32xf32>
    %cst_89 = arith.constant dense<0.000000e+00> : vector<2x8xf32>
    %333 = vector.multi_reduction <add>, %332, %cst_89 [2] : vector<2x8x32xf32> to vector<2x8xf32>
    %cst_90 = arith.constant 0.176776692 : f32
    %334 = vector.broadcast %cst_90 : f32 to vector<2x8xf32>
    %335 = arith.mulf %333, %334 : vector<2x8xf32>
    %cst_91 = arith.constant dense<0xFF800000> : vector<2xf32>
    %336 = vector.multi_reduction <maximumf>, %335, %cst_91 [1] : vector<2x8xf32> to vector<2xf32>
    %337 = vector.shape_cast %336 : vector<2xf32> to vector<2x1xf32>
    %338 = vector.broadcast %337 : vector<2x1xf32> to vector<2x8xf32>
    %339 = arith.subf %335, %338 : vector<2x8xf32>
    %340 = math.exp %339 : vector<2x8xf32>
    %cst_92 = arith.constant dense<0.000000e+00> : vector<2xf32>
    %341 = vector.multi_reduction <add>, %340, %cst_92 [1] : vector<2x8xf32> to vector<2xf32>
    %342 = vector.shape_cast %341 : vector<2xf32> to vector<2x1xf32>
    %343 = vector.broadcast %342 : vector<2x1xf32> to vector<2x8xf32>
    %344 = arith.divf %340, %343 : vector<2x8xf32>
    %345 = vector.shape_cast %344 : vector<2x8xf32> to vector<2x8x1xf32>
    %346 = vector.broadcast %345 : vector<2x8x1xf32> to vector<2x8x32xf32>
    %347 = arith.mulf %329, %346 : vector<2x8x32xf32>
    %cst_93 = arith.constant dense<0.000000e+00> : vector<2x32xf32>
    %348 = vector.multi_reduction <add>, %347, %cst_93 [1] : vector<2x8x32xf32> to vector<2x32xf32>
    %c0_94 = arith.constant 0 : index
    %c0_95 = arith.constant 0 : index
    %349 = vector.load %arg6[%c0_94, %c0_95] : memref<32x4xf32, #tpu.memory_space<vmem>>, vector<32x4xf32>
    %cst_96 = arith.constant dense<0.000000e+00> : vector<2x4xf32>
    %350 = tpu.matmul %348, %349, %cst_96 {dimension_numbers = #tpu.dot_dimension_numbers<[1], [0], [0], [1], [0, 0, 1, 1], [], []>} : vector<2x32xf32>, vector<32x4xf32>, vector<2x4xf32> -> vector<2x4xf32>
    %c0_97 = arith.constant 0 : index
    %c0_98 = arith.constant 0 : index
    %351 = vector.load %arg7[%c0_97, %c0_98] : memref<1x4xf32, #tpu.memory_space<vmem>>, vector<1x4xf32>
    %352 = vector.broadcast %351 : vector<1x4xf32> to vector<2x4xf32>
    %353 = arith.addf %350, %352 : vector<2x4xf32>
    %c0_99 = arith.constant 0 : index
    %c0_100 = arith.constant 0 : index
    %354 = vector.load %arg8[%c0_99, %c0_100] : memref<2x4xf32, #tpu.memory_space<vmem>>, vector<2x4xf32>
    tpu.vector_store %arg8[%c0_99, %c0_100], %353 {strides = array<i32>} : memref<2x4xf32, #tpu.memory_space<vmem>>, vector<2x4xf32>,
    %c0_101 = arith.constant 0 : index
    %c0_102 = arith.constant 0 : index
    %355 = vector.load %arg9[%c0_101, %c0_102] : memref<2x8xf32, #tpu.memory_space<vmem>>, vector<2x8xf32>
    tpu.vector_store %arg9[%c0_101, %c0_102], %344 {strides = array<i32>} : memref<2x8xf32, #tpu.memory_space<vmem>>, vector<2x8xf32>,
    return
  }
}

</mosaic_0001>

<bundles_post_ra>
// kernel: tpu_custom_call.1
= control target key start
LH: loop header
LB: loop body
LE: loop exit
PB: predicated region body
PF: predicated region fallthrough
CT: control target
= control target key end

     0   :  { %15 = vsyncpa [#allocation3], 0  ;;  %s4328_s0 = inlined_call_operand.vmem [shape: f32[16,32], index: 0, kind: input, shape index: {}]   ;;  %s4329_s1 = inlined_call_operand.vmem [shape: s32[2,1], index: 1, kind: input, shape index: {}]   ;;  %s4330_s2 = inlined_call_operand.hbm [shape: f32[3,32,32], index: 2, kind: input, shape index: {}]   ;;  %s4331_s3 = inlined_call_operand.hbm [shape: f32[3,32,32], index: 3, kind: input, shape index: {}]   ;;  %s4332_s4 = inlined_call_operand.vmem [shape: f32[3,1,32], index: 4, kind: input, shape index: {}]   ;;  %s4333_s5 = inlined_call_operand.vmem [shape: f32[1,32], index: 5, kind: input, shape index: {}]   ;;  %s4334_s6 = inlined_call_operand.vmem [shape: f32[32,4], index: 6, kind: input, shape index: {}]   ;;  %s4335_s7 = inlined_call_operand.vmem [shape: f32[1,4], index: 7, kind: input, shape index: {}]   ;;  %s4336_s8 = inlined_call_operand.hbm [shape: f32[2,4], index: 8, kind: output, shape index: {0}]   ;;  %s4337_s9 = inlined_call_operand.hbm [shape: f32[2,8], index: 9, kind: output, shape index: {1}]  }
   0x1   :  { %16 = vsyncpa [#allocation6], 0 }
   0x2   :  { %17 = vsyncpa [#allocation4], 0 }
   0x3   :  { %18 = vsyncpa [#allocation9], 0  ;;  %s3792_s30 = smov [#allocation2]   ;;  %s3696_s13 = scalar_lea.hbm %s4330_s2, 1536 }
   0x4   :  { %s28_s10 = sshll.u32 %s3792_s30, 4  ;;  %p3697_p0 = scmp.ne.s32.totalorder %s4330_s2, %s3696_s13  ;;  %s29_s10 = int_to_ptr.vmem [resolvable:$true] %s28_s10 }
   0x5   :  { %p3700_p1 = scmp.lt.u32.totalorder %s3696_s13, %s4330_s2 }
   0x7   :  { %p3702_p2 = pnand %p3700_p1, %p3697_p0 }
   0x9   :  { %3705 = shalt.err (!%p3702_p2)
}
   0xa   :  { %s3706_s18 = scalar_lea.vmem %s29_s10, 1536  ;;  %p3711_p4 = scmp.lt.s32.totalorder %s29_s10, %s29_s10 }
   0xb   :  { %p3707_p3 = scmp.ne.s32.totalorder %s29_s10, %s3706_s18  ;;  %p3712_p5 = scmp.lt.s32.totalorder %s3706_s18, %s3706_s18 }
   0xd   :  { %p3713_p6 = por %p3712_p5, %p3711_p4 }
   0xf   :  { %p3714_p7 = pnand %p3713_p6, %p3707_p3 }
  0x11   :  { %3717 = shalt.err (!%p3714_p7)
}
  0x12   :  { %s3793_s19 = smov 128   ;;  %s3794_s20 = smov 8  }
  0x13   :  { %34 = dma.hbm_to_vmem [thread:$0]  %s4330_s2, 1536, %s29_s10, [#allocation3], %s3793_s19, %s3793_s19, %s3794_s20  }
  0x14   :  { %s3795_s23 = smov [#allocation5]   ;;  %s3718_s27 = scalar_lea.hbm %s4331_s3, 1536 }
  0x15   :  { %s40_s24 = sshll.u32 %s3795_s23, 4  ;;  %p3719_p8 = scmp.ne.s32.totalorder %s4331_s3, %s3718_s27  ;;  %s41_s24 = int_to_ptr.vmem [resolvable:$true] %s40_s24 }
  0x16   :  { %p3722_p9 = scmp.lt.u32.totalorder %s3718_s27, %s4331_s3 }
  0x18   :  { %p3724_p10 = pnand %p3722_p9, %p3719_p8 }
  0x1a   :  { %3727 = shalt.err (!%p3724_p10)
}
  0x1b   :  { %s3728_s12 = scalar_lea.vmem %s41_s24, 1536  ;;  %p3733_p12 = scmp.lt.s32.totalorder %s41_s24, %s41_s24 }
  0x1c   :  { %p3729_p11 = scmp.ne.s32.totalorder %s41_s24, %s3728_s12  ;;  %p3734_p13 = scmp.lt.s32.totalorder %s3728_s12, %s3728_s12 }
  0x1e   :  { %p3735_p0 = por %p3734_p13, %p3733_p12 }
  0x20   :  { %p3736_p1 = pnand %p3735_p0, %p3729_p11 }
  0x22   :  { %3739 = shalt.err (!%p3736_p1)
}
  0x23   :  { %46 = dma.hbm_to_vmem [thread:$0]  %s4331_s3, 1536, %s41_s24, [#allocation6], %s3793_s19, %s3793_s19, %s3794_s20  }
  0x24   :  { %3784 = dma.done.wait [#allocation3], 1536  }
  0x25   :  { %3785 = vsyncadd [#allocation3], 4294965760 }
  0x26   :  { %3786 = dma.done.wait [#allocation6], 1536  }
  0x27   :  { %3787 = vsyncadd [#allocation6], 4294965760  ;;  %v3796_v0 = vmov 0   ;;  %v64_v1 = vld [vmem:[#allocation2] sm:$0xff]  ;;  %v65_v2 = vld [vmem:[#allocation2 + $0x8] sm:$0xff]  ;;  %vm75_vm0 = vcmask 261120  }
  0x28   :  { %3606 = vset.pattern.permute.xlu0 %v3796_v0  ;;  %3607 = vset.pattern.permute.xlu1 %v3796_v0  ;;  %v158_v3 = vld [vmem:[#allocation2 + $0x20] sm:$0xff]  ;;  %v3421_v4 = vpack.c.bf16 %v65_v2, %v64_v1  ;;  %v159_v5 = vld [vmem:[#allocation2 + $0x28] sm:$0xff]  ;;  %v66_v6 = vld [vmem:[#allocation2 + $0x10] sm:$0xff]  ;;  %v3797_v25 = vmov 0.0|0.0   ;;  %vm3798_vm4 = vmmov 0   ;;  %v3799_v33 = vmov 0.0  }
  0x29   :  { %v67_v7 = vld [vmem:[#allocation2 + $0x18] sm:$0xff]  ;;  %v3429_v8 = vpack.c.bf16 %v159_v5, %v158_v3  ;;  %v160_v10 = vld [vmem:[#allocation2 + $0x30] sm:$0xff]  ;;  %v62_v12 = vld [vmem:[%s4328_s0] sm:$0xff]  ;;  %vm2628_vm13 = vcmask 1040384   ;;  %vm2631_vm14 = vcmask 1041408  }
  0x2a   :  { %v3425_v9 = vpack.c.bf16 %v67_v7, %v66_v6  ;;  %v161_v11 = vld [vmem:[#allocation2 + $0x38] sm:$0xff]  ;;  %3422 = vmatprep.subr.bf16.mxu0 %v3421_v4  ;;  %3132 = vmatprep.mubr.msk.f32.mxu1 %vm75_vm0, %v62_v12  ;;  %v246_v14 = vld [vmem:[#allocation2 + $0x40] sm:$0xff]  ;;  %v247_v15 = vld [vmem:[#allocation2 + $0x48] sm:$0xff] }
  0x2b   :  { %v3433_v13 = vpack.c.bf16 %v161_v11, %v160_v10  ;;  %3430 = vmatprep.subr.bf16.mxu1 %v3429_v8  ;;  %3424 = vmatpush3.bf16.msra.mxu0 %v3421_v4  ;;  %v3437_v16 = vpack.c.bf16 %v247_v15, %v246_v14  ;;  %v333_v17 = vld [vmem:[#allocation5] sm:$0xff]  ;;  %v334_v18 = vld [vmem:[#allocation5 + $0x8] sm:$0xff]  ;;  %v248_v19 = vld [vmem:[#allocation2 + $0x50] sm:$0xff] }
  0x2c   :  { %3432 = vmatpush3.bf16.msra.mxu1 %v3429_v8  ;;  %3426 = vmatprep.subr.bf16.mxu0 %v3425_v9  ;;  %v249_v20 = vld [vmem:[#allocation2 + $0x58] sm:$0xff]  ;;  %v63_v21 = vld [vmem:[%s4328_s0 + $0x8] sm:$0xff]  ;;  %v3890_v22 = vld [vmem:[%s4329_s1] sm:$0x3]  ;;  %v3892_v23 = vpack.c.bf16 %v334_v18, %v333_v17 }
  0x2d   :  { %3434 = vmatprep.subr.bf16.mxu1 %v3433_v13  ;;  %3121 = vmatprep.mubr.msk.f32.mxu0 %vm75_vm0, %v62_v12  ;;  %v3441_v24 = vpack.c.bf16 %v249_v20, %v248_v19  ;;  %vm588_vm1 = vcmp.gt.s32.totalorder %v3890_v22, 0  ;;  %vm840_vm2 = vcmp.gt.s32.totalorder %v3890_v22, 1  ;;  %v335_v26 = vld [vmem:[#allocation5 + $0x10] sm:$0xff]  ;;  %v336_v27 = vld [vmem:[#allocation5 + $0x18] sm:$0xff]  ;;  %v338_v31 = vld [vmem:[#allocation5 + $0x20] sm:$0xff]  ;;  %vm1597_vm3 = vcmp.gt.s32.totalorder %v3890_v22, 4 }
  0x2e   :  { %v589_v28 = vsel %vm588_vm1, 1, %v3796_v0  ;;  %v841_v29 = vsel %vm840_vm2, 1, %v3796_v0  ;;  %v3902_v30 = vpack.c.bf16 %v336_v27, %v335_v26  ;;  %v339_v32 = vld [vmem:[#allocation5 + $0x28] sm:$0xff]  ;;  %v343_v34 = vld [vmem:[#allocation5 + $0x40] sm:$0xff]  ;;  %v1598_v37 = vsel %vm1597_vm3, 1, %v3796_v0  ;;  %v340_v38 = vld [vmem:[#allocation5 + $0x30] sm:$0xff] }
  0x2f   :  { %3428 = vmatpush3.bf16.msra.mxu0 %v3425_v9  ;;  %591 = vperm.xlu0 %3606, %v589_v28   ;;  %v344_v35 = vld [vmem:[#allocation5 + $0x48] sm:$0xff]  ;;  %v3909_v36 = vpack.c.bf16 %v339_v32, %v338_v31  ;;  %v341_v39 = vld [vmem:[#allocation5 + $0x38] sm:$0xff]  ;;  %vm2106_vm5 = vcmp.gt.s32.totalorder %v3890_v22, 6  ;;  %v345_v41 = vld [vmem:[#allocation5 + $0x50] sm:$0xff]  ;;  %vm1096_vm7 = vcmp.gt.s32.totalorder %v3890_v22, 2  ;;  %vm1352_vm8 = vcmp.gt.s32.totalorder %v3890_v22, 3 }
  0x30   :  { %3436 = vmatpush3.bf16.msra.mxu1 %v3433_v13  ;;  %3438 = vmatprep.subr.bf16.mxu0 %v3437_v16  ;;  %v3916_v40 = vpack.c.bf16 %v344_v35, %v343_v34  ;;  %v346_v42 = vld [vmem:[#allocation5 + $0x58] sm:$0xff]  ;;  %v3921_v43 = vpack.c.bf16 %v341_v39, %v340_v38  ;;  %v2107_v44 = vsel %vm2106_vm5, 1, %v3796_v0  ;;  %v2919_v46 = vld [vmem:[%s4332_s4] ss:$0 sm:$0xff]  ;;  %v2923_v47 = vld [vmem:[%s4332_s4 + $0x1] ss:$0 sm:$0xff] }
  0x31   :  { %3445 = vmatprep.subr.bf16.mxu1 %v3797_v25  ;;  %v3928_v45 = vpack.c.bf16 %v346_v42, %v345_v41  ;;  %v2927_v55 = vld [vmem:[%s4332_s4 + $0x2] ss:$0 sm:$0xff]  ;;  %v3975_v10 = vld [vmem:[%s4333_s5] ss:$0 sm:$0xff]  ;;  %v1097_v28 = vsel %vm1096_vm7, 1, %v3796_v0  ;;  %vm1850_vm9 = vcmp.gt.s32.totalorder %v3890_v22, 5 }
  0x32   :  { %3122 = vmatmul.mubr.msk.f32.vlgmr.msra.gmra.mrb[0].mxu0 %vm75_vm0, %v63_v21  ;;  %1099 = vperm.xlu1 %3607, %v1097_v28   ;;  %v1851_v31 = vsel %vm1850_vm9, 1, %v3796_v0  ;;  %vm2362_vm10 = vcmp.gt.s32.totalorder %v3890_v22, 7  ;;  %vm2634_vm1 = vcmask 1042432   ;;  %vm2637_vm3 = vcmask 1043456  }
  0x33   :  { %3133 = vmatmul.mubr.msk.f32.vlgmr.msra.gmra.mrb[0].mxu1 %vm75_vm0, %v63_v21  ;;  %3440 = vmatpush3.bf16.msra.mxu0 %v3437_v16  ;;  %v2363_v32 = vsel %vm2362_vm10, 1, %v3796_v0  ;;  %vm2646_vm9 = vcmask 1046528   ;;  %vm2704_vm10 = vcmask 1041409  }
  0x34   :  { %3447 = vmatpush3.bf16.msra.mxu1 %v3892_v23  ;;  %3442 = vmatprep.subr.bf16.mxu0 %v3441_v24 }
  0x35   :  { %3448 = vmatprep.subr.bf16.mxu1 %v3797_v25  ;;  %3154 = vmatprep.mubr.msk.f32.mxu1 %vm3798_vm4, %v3799_v33 }
  0x36   :  { %3143 = vmatprep.mubr.msk.f32.mxu0 %vm75_vm0, %v62_v12  ;;  %843 = vperm.xlu0 %3606, %v841_v29   ;;  %v1353_v29 = vsel %vm1352_vm8, 1, %v3796_v0  ;;  %vm2643_vm8 = vcmask 1045504  }
  0x37   :  { %3444 = vmatpush3.bf16.msra.mxu0 %v3441_v24  ;;  %1355 = vperm.xlu1 %3607, %v1353_v29  }
  0x38   :  { %3450 = vmatpush3.bf16.msra.mxu1 %v3902_v30  ;;  %3451 = vmatprep.subr.bf16.mxu0 %v3797_v25 }
  0x39   :  { %3457 = vmatprep.subr.bf16.mxu1 %v3797_v25 }
  0x3a   :  { %3144 = vmatmul.mubr.msk.f32.vlgmr.msra.gmra.mrb[2].mxu0 %vm75_vm0, %v63_v21  ;;  %1600 = vperm.xlu0 %3606, %v1598_v37  }
  0x3b   :  { %3155 = vmatmul.mubr.f32.vlgmr.msra.gmra.mrb[2].mxu1 %v3799_v33  ;;  %3453 = vmatpush3.bf16.msra.mxu0 %v3909_v36 }
  0x3c   :  { %3454 = vmatprep.subr.bf16.mxu0 %v3797_v25  ;;  %3165 = vmatprep.mubr.msk.f32.mxu0 %vm3798_vm4, %v3799_v33 }
  0x3d   :  { %3459 = vmatpush3.bf16.msra.mxu1 %v3916_v40  ;;  %3176 = vmatprep.mubr.msk.f32.mxu1 %vm3798_vm4, %v3799_v33 }
  0x3e   :  { %3460 = vmatprep.subr.bf16.mxu1 %v3797_v25  ;;  %2109 = vperm.xlu0 %3606, %v2107_v44  }
  0x3f   :  { %3456 = vmatpush3.bf16.msra.mxu0 %v3921_v43  ;;  %1853 = vperm.xlu1 %3607, %v1851_v31  }
  0x40   :  { %3463 = vmatprep.subr.bf16.mxu0 %v3797_v25 }
  0x41   :  { %3462 = vmatpush3.bf16.msra.mxu1 %v3928_v45 }
  0x42   :  { %3166 = vmatmul.mubr.f32.vlgmr.msra.gmra.mrb[4].mxu0 %v3799_v33  ;;  %3469 = vmatprep.subr.bf16.mxu1 %v3797_v25 }
  0x43   :  { %3465 = vmatpush3.bf16.msra.mxu0 %v3892_v23  ;;  %3187 = vmatprep.mubr.msk.f32.mxu0 %vm3798_vm4, %v3799_v33 }
  0x44   :  { %3177 = vmatmul.mubr.f32.vlgmr.msra.gmra.mrb[4].mxu1 %v3799_v33  ;;  %3466 = vmatprep.subr.bf16.mxu0 %v3797_v25 }
  0x45   :  { %3471 = vmatpush3.bf16.msra.mxu1 %v3909_v36  ;;  %3198 = vmatprep.mubr.msk.f32.mxu1 %vm3798_vm4, %v3799_v33 }
  0x46   :  { %3472 = vmatprep.subr.bf16.mxu1 %v3797_v25  ;;  %2365 = vperm.xlu1 %3607, %v2363_v32  }
  0x47   :  { %3468 = vmatpush3.bf16.msra.mxu0 %v3902_v30 }
  0x48   :  { %3475 = vmatprep.subr.bf16.mxu0 %v3797_v25 }
  0x49   :  { %3474 = vmatpush3.bf16.msra.mxu1 %v3921_v43 }
  0x4a   :  { %3481 = vmatprep.subr.bf16.mxu1 %v3797_v25 }
  0xae   :  { %v592_v24 = vpop.permute.xlu0 %591 }
  0xaf   :  { %vm593_vm6 = vcmp.eq.s32.totalorder %v592_v24, 1 }
 0x105   :  { %v3123_v48 = vpop.f32.mrb[0].mxu0 }
 0x106   :  { %v3134_v49 = vpop.f32.mrb[0].mxu1  ;;  %v3957_v50 = vadd.f32 %v3123_v48, %v2919_v46  ;;  %v148_v51 = vpop.f32.mrb[1].mxu0 }
 0x107   :  { %v3959_v52 = vadd.f32 %v3134_v49, %v2923_v47  ;;  %v236_v53 = vpop.f32.mrb[1].mxu1  ;;  %v3961_v54 = vadd.f32 %v2919_v46, %v148_v51 }
 0x108   :  { %v3969_v63 = vadd.f32 %v2923_v47, %v236_v53 }
 0x10d   :  { %v3145_v56 = vpop.f32.mrb[2].mxu0 }
 0x10e   :  { %v423_v57 = vpop.f32.mrb[2].mxu1  ;;  %v3966_v58 = vadd.f32 %v3145_v56, %v2927_v55  ;;  %v324_v59 = vpop.f32.mrb[3].mxu0 }
 0x10f   :  { %v567_v60 = vadd.f32 %v423_v57, %v3961_v54  ;;  %v3156_v61 = vpop.f32.mrb[3].mxu1  ;;  %v3978_v14 = vadd.f32 %v2927_v55, %v324_v59 }
 0x111   :  { %v2931_v62 = vmul.f32 -1.442695, %v567_v60 }
 0x113   :  { %3608 = vpow2.f32 %v2931_v62 }
 0x115   :  { %v493_v1 = vpop.f32.mrb[4].mxu0 }
 0x116   :  { %v574_v2 = vadd.f32 %v493_v1, %v3969_v63  ;;  %v3167_v3 = vpop.f32.mrb[5].mxu0 }
 0x117   :  { %v563_v4 = vpop.f32.mrb[4].mxu1 }
 0x118   :  { %v2932_v5 = vmul.f32 -1.442695, %v574_v2  ;;  %v3178_v6 = vpop.f32.mrb[5].mxu1  ;;  %v564_v12 = vadd.f32 %v3975_v10, %v563_v4 }
 0x119   :  { %v844_v6 = vpop.permute.xlu0 %843 }
 0x11a   :  { %3610 = vpow2.f32 %v2932_v5  ;;  %vm845_vm11 = vcmp.eq.s32.totalorder %v844_v6, 1 }
 0x11d   :  { %v3609_v7 = vpop.eup %3608 }
 0x11e   :  { %v571_v8 = vadd.f32 1.0, %v3609_v7 }
 0x120   :  { %3612 = vrcp.f32 %v571_v8 }
 0x124   :  { %v3611_v9 = vpop.eup %3610 }
 0x125   :  { %v578_v11 = vadd.f32 1.0, %v3611_v9 }
 0x127   :  { %3614 = vrcp.f32 %v578_v11 }
 0x12a   :  { %v3613_v13 = vpop.eup %3612 }
 0x12b   :  { %v581_v15 = vmul.f32 %v3613_v13, %v564_v12 }
 0x12d   :  { %v582_v16 = vadd.f32 %v581_v15, %v3978_v14 }
 0x12f   :  { %3616 = vtanh.f32 %v582_v16 }
 0x131   :  { %v3615_v17 = vpop.eup %3614 }
 0x132   :  { %v584_v18 = vsub.f32 1.0, %v3615_v17  ;;  %v586_v21 = vmul.f32 0.0, %v3615_v17 }
 0x139   :  { %v3617_v19 = vpop.eup %3616 }
 0x13a   :  { %v585_v20 = vmul.f32 %v3617_v19, %v584_v18 }
 0x13c   :  { %v587_v26 = vadd.f32 %v586_v21, %v585_v20 }
 0x13e   :  { %v3981_v27 = vsel %vm593_vm6, %v587_v26, 0.0  ;;  %vm2640_vm6 = vcmask 1044480  }
 0x13f   :  { %3188 = vmatmul.mubr.msk.f32.vlgmr.msra.gmra.mrb[6].mxu0 %vm75_vm0, %v3981_v27  ;;  %3199 = vmatmul.mubr.msk.f32.vlgmr.msra.gmra.mrb[6].mxu1 %vm75_vm0, %v3981_v27  ;;  %v836_v62 = vrot.slane %v3981_v27, 6 }
 0x140   :  { %3477 = vmatpush3.bf16.msra.mxu0 %v3916_v40  ;;  %3209 = vmatprep.mubr.msk.f32.mxu0 %vm3798_vm4, %v3799_v33 }
 0x141   :  { %3478 = vmatprep.subr.bf16.mxu0 %v3797_v25  ;;  %3483 = vmatpush3.bf16.msra.mxu1 %v3892_v23 }
 0x142   :  { %3484 = vmatprep.subr.bf16.mxu1 %v3797_v25  ;;  %3220 = vmatprep.mubr.msk.f32.mxu1 %vm3798_vm4, %v3799_v33 }
 0x144   :  { %3480 = vmatpush3.bf16.msra.mxu0 %v3928_v45 }
 0x145   :  { %3487 = vmatprep.subr.bf16.mxu0 %v3797_v25  ;;  %3486 = vmatpush3.bf16.msra.mxu1 %v3902_v30 }
 0x146   :  { %3493 = vmatprep.subr.bf16.mxu1 %v3797_v25 }
 0x147   :  { %3210 = vmatmul.mubr.msk.f32.vlgmr.msra.gmra.mrb[8].mxu0 %vm75_vm0, %v3981_v27 }
 0x148   :  { %3489 = vmatpush3.bf16.msra.mxu0 %v3909_v36  ;;  %3231 = vmatprep.mubr.msk.f32.mxu0 %vm3798_vm4, %v3799_v33 }
 0x149   :  { %3490 = vmatprep.subr.bf16.mxu0 %v3797_v25 }
 0x14c   :  { %3492 = vmatpush3.bf16.msra.mxu0 %v3921_v43 }
 0x14d   :  { %3499 = vmatprep.subr.bf16.mxu0 %v3797_v25 }
 0x212   :  { %v664_v34 = vpop.f32.mrb[6].mxu0  ;;  %v734_v35 = vpop.f32.mrb[6].mxu1 }
 0x213   :  { %v809_v37 = vrot.slane %v664_v34, 6  ;;  %v3189_v38 = vpop.f32.mrb[7].mxu0  ;;  %v3200_v39 = vpop.f32.mrb[7].mxu1  ;;  %v819_v41 = vrot.slane %v734_v35, 6 }
 0x215   :  { %v811_v42 = vadd.f32 %v809_v37, %v3961_v54  ;;  %v821_v46 = vadd.f32 %v819_v41, %v3969_v63  ;;  %v3800_v41 = vmov 1966171168  }
 0x217   :  { %v2936_v44 = vmul.f32 -1.442695, %v811_v42  ;;  %v2937_v49 = vmul.f32 -1.442695, %v821_v46  ;;  %v2374_v42 = vunpack.c.l.s4 %v3800_v41 }
 0x219   :  { %3618 = vpow2.f32 %v2936_v44  ;;  %v2376_v44 = vlaneseq  ;;  %v2375_v46 = vunpack.c.0.s8 %v2374_v42 }
 0x21a   :  { %v804_v47 = vpop.f32.mrb[8].mxu0  ;;  %3620 = vpow2.f32 %v2937_v49 }
 0x21b   :  { %v3211_v48 = vpop.f32.mrb[9].mxu0  ;;  %v805_v53 = vadd.f32 %v3975_v10, %v804_v47  ;;  %v4052_v47 = vshrl.u32 %v2376_v44, 7 }
 0x21d   :  { %v829_v56 = vrot.slane %v805_v53, 6  ;;  %v4055_v49 = vsub.s32 %v2375_v46, %v4052_v47 }
 0x223   :  { %v3619_v22 = vpop.eup %3618 }
 0x224   :  { %v815_v51 = vadd.f32 1.0, %v3619_v22  ;;  %v3621_v0 = vpop.eup %3620 }
 0x225   :  { %v825_v55 = vadd.f32 1.0, %v3621_v0 }
 0x226   :  { %3622 = vrcp.f32 %v815_v51 }
 0x227   :  { %3624 = vrcp.f32 %v825_v55 }
 0x230   :  { %v3623_v57 = vpop.eup %3622 }
 0x231   :  { %v831_v59 = vmul.f32 %v3623_v57, %v829_v56  ;;  %v3625_v61 = vpop.eup %3624 }
 0x232   :  { %v834_v1 = vsub.f32 1.0, %v3625_v61  ;;  %v838_v4 = vmul.f32 %v3625_v61, %v836_v62  ;;  %v2379_v61 = vrot.slane %v3981_v27, %v4055_v49 }
 0x233   :  { %v832_v60 = vadd.f32 %v831_v59, %v3978_v14  ;;  %v1100_v59 = vpop.permute.xlu1 %1099 }
 0x234   :  { %vm1101_vm12 = vcmp.eq.s32.totalorder %v1100_v59, 1 }
 0x235   :  { %3626 = vtanh.f32 %v832_v60 }
 0x23f   :  { %v3627_v2 = vpop.eup %3626 }
 0x240   :  { %v835_v3 = vmul.f32 %v3627_v2, %v834_v1  ;;  %v4063_v1 = vsub.s32 0, %v4052_v47 }
 0x242   :  { %v839_v5 = vadd.f32 %v838_v4, %v835_v3 }
 0x244   :  { %v847_v7 = vrot.slane %v839_v5, 2 }
 0x246   :  { %v4021_v8 = vsel %vm845_vm11, %v847_v7, %v3981_v27  ;;  %v850_v9 = vsel %vm845_vm11, %v847_v7, 0.0  ;;  %v2380_v27 = vcombine.high %v2379_v61, %v2379_v61  ;;  %vm2707_vm11 = vcmask 58368  }
 0x247   :  { %3221 = vmatmul.mubr.msk.f32.vlgmr.msra.gmra.mrb[8].mxu1 %vm75_vm0, %v4021_v8  ;;  %3232 = vmatmul.mubr.msk.f32.vlgmr.msra.gmra.mrb[10].mxu0 %vm75_vm0, %v4021_v8  ;;  %v2404_v22 = vrot.slane %v850_v9, %v4055_v49  ;;  %v1092_v0 = vrot.slane %v4021_v8, 4 }
 0x248   :  { %3495 = vmatpush3.bf16.msra.mxu1 %v3916_v40  ;;  %3242 = vmatprep.mubr.msk.f32.mxu1 %vm3798_vm4, %v3799_v33 }
 0x249   :  { %3496 = vmatprep.subr.bf16.mxu1 %v3797_v25  ;;  %3501 = vmatpush3.bf16.msra.mxu0 %v3892_v23  ;;  %v2405_v57 = vcombine.high %v2404_v22, %v2404_v22  ;;  %v2412_v62 = vrot.slane %v2404_v22, %v4055_v49 }
 0x24a   :  { %3502 = vmatprep.subr.bf16.mxu0 %v3797_v25  ;;  %3253 = vmatprep.mubr.msk.f32.mxu0 %vm3798_vm4, %v3799_v33 }
 0x24b   :  { %v2419_v3 = vrot.slane %v2405_v57, %v4055_v49  ;;  %v2561_v7 = vrot.slane %v2412_v62, %v4063_v1 }
 0x24c   :  { %3498 = vmatpush3.bf16.msra.mxu1 %v3928_v45 }
 0x24d   :  { %3505 = vmatprep.subr.bf16.mxu1 %v3797_v25  ;;  %3504 = vmatpush3.bf16.msra.mxu0 %v3902_v30 }
 0x24e   :  { %3511 = vmatprep.subr.bf16.mxu0 %v3797_v25 }
 0x24f   :  { %3243 = vmatmul.mubr.msk.f32.vlgmr.msra.gmra.mrb[10].mxu1 %vm75_vm0, %v4021_v8 }
 0x250   :  { %3507 = vmatpush3.bf16.msra.mxu1 %v3909_v36  ;;  %3264 = vmatprep.mubr.msk.f32.mxu1 %vm3798_vm4, %v3799_v33 }
 0x251   :  { %3508 = vmatprep.subr.bf16.mxu1 %v3797_v25 }
 0x254   :  { %3510 = vmatpush3.bf16.msra.mxu1 %v3921_v43 }
 0x255   :  { %3517 = vmatprep.subr.bf16.mxu1 %v3797_v25 }
 0x31a   :  { %v920_v11 = vpop.f32.mrb[8].mxu1  ;;  %v990_v12 = vpop.f32.mrb[10].mxu0 }
 0x31b   :  { %v1065_v13 = vrot.slane %v920_v11, 4  ;;  %v3222_v15 = vpop.f32.mrb[9].mxu1  ;;  %v3233_v16 = vpop.f32.mrb[11].mxu0  ;;  %v1075_v17 = vrot.slane %v990_v12, 4  ;;  %v2387_v11 = vrot.slane %v2379_v61, %v4055_v49  ;;  %v2565_v12 = vrot.slane %v2419_v3, %v4063_v1 }
 0x31c   :  { %v2394_v16 = vrot.slane %v2380_v27, %v4055_v49 }
 0x31d   :  { %v1067_v18 = vadd.f32 %v1065_v13, %v3961_v54  ;;  %v1077_v20 = vadd.f32 %v1075_v17, %v3969_v63  ;;  %v2629_v17 = vsel %vm2628_vm13, %v2387_v11, %v2561_v7 }
 0x31f   :  { %v2941_v19 = vmul.f32 -1.442695, %v1067_v18  ;;  %v2942_v26 = vmul.f32 -1.442695, %v1077_v20  ;;  %v2630_v20 = vsel %vm2628_vm13, %v2394_v16, %v2565_v12 }
 0x321   :  { %3628 = vpow2.f32 %v2941_v19 }
 0x322   :  { %v1060_v21 = vpop.f32.mrb[10].mxu1  ;;  %3630 = vpow2.f32 %v2942_v26 }
 0x323   :  { %v3244_v24 = vpop.f32.mrb[11].mxu1  ;;  %v1061_v32 = vadd.f32 %v3975_v10, %v1060_v21 }
 0x325   :  { %v1085_v35 = vrot.slane %v1061_v32, 4 }
 0x32b   :  { %v3629_v28 = vpop.eup %3628 }
 0x32c   :  { %v1071_v29 = vadd.f32 1.0, %v3629_v28  ;;  %v3631_v31 = vpop.eup %3630 }
 0x32d   :  { %v1081_v34 = vadd.f32 1.0, %v3631_v31 }
 0x32e   :  { %3632 = vrcp.f32 %v1071_v29 }
 0x32f   :  { %3634 = vrcp.f32 %v1081_v34 }
 0x338   :  { %v3633_v37 = vpop.eup %3632 }
 0x339   :  { %v1087_v38 = vmul.f32 %v3633_v37, %v1085_v35  ;;  %v3635_v48 = vpop.eup %3634 }
 0x33a   :  { %v1090_v51 = vsub.f32 1.0, %v3635_v48  ;;  %v1094_v56 = vmul.f32 %v3635_v48, %v1092_v0 }
 0x33b   :  { %v1088_v39 = vadd.f32 %v1087_v38, %v3978_v14 }
 0x33d   :  { %3636 = vtanh.f32 %v1088_v39 }
 0x347   :  { %v3637_v53 = vpop.eup %3636 }
 0x348   :  { %v1091_v55 = vmul.f32 %v3637_v53, %v1090_v51 }
 0x34a   :  { %v1095_v60 = vadd.f32 %v1094_v56, %v1091_v55 }
 0x34c   :  { %v1103_v2 = vrot.slane %v1095_v60, 4 }
 0x34e   :  { %v4067_v4 = vsel %vm1101_vm12, %v1103_v2, %v4021_v8  ;;  %v1106_v5 = vsel %vm1101_vm12, %v1103_v2, 0.0  ;;  %v1356_v2 = vpop.permute.xlu1 %1355 }
 0x34f   :  { %v2427_v6 = vrot.slane %v1106_v5, %v4055_v49  ;;  %3254 = vmatmul.mubr.msk.f32.vlgmr.msra.gmra.mrb[12].mxu0 %vm75_vm0, %v4067_v4  ;;  %3265 = vmatmul.mubr.msk.f32.vlgmr.msra.gmra.mrb[12].mxu1 %vm75_vm0, %v4067_v4  ;;  %v1348_v56 = vrot.slane %v4067_v4, 2  ;;  %vm1357_vm15 = vcmp.eq.s32.totalorder %v1356_v2, 1 }
 0x350   :  { %3513 = vmatpush3.bf16.msra.mxu0 %v3916_v40  ;;  %3275 = vmatprep.mubr.msk.f32.mxu0 %vm3798_vm4, %v3799_v33 }
 0x351   :  { %v2428_v8 = vcombine.high %v2427_v6, %v2427_v6  ;;  %v2435_v9 = vrot.slane %v2427_v6, %v4055_v49  ;;  %3514 = vmatprep.subr.bf16.mxu0 %v3797_v25  ;;  %3519 = vmatpush3.bf16.msra.mxu1 %v3892_v23 }
 0x352   :  { %3520 = vmatprep.subr.bf16.mxu1 %v3797_v25  ;;  %3286 = vmatprep.mubr.msk.f32.mxu1 %vm3798_vm4, %v3799_v33 }
 0x353   :  { %v2442_v13 = vrot.slane %v2428_v8, %v4055_v49  ;;  %v2571_v15 = vrot.slane %v2435_v9, %v4063_v1 }
 0x354   :  { %3516 = vmatpush3.bf16.msra.mxu0 %v3928_v45 }
 0x355   :  { %v2575_v18 = vrot.slane %v2442_v13, %v4063_v1  ;;  %v4092_v19 = vsel %vm2631_vm14, %v2629_v17, %v2571_v15  ;;  %3523 = vmatprep.subr.bf16.mxu0 %v3797_v25  ;;  %3522 = vmatpush3.bf16.msra.mxu1 %v3902_v30 }
 0x356   :  { %3529 = vmatprep.subr.bf16.mxu1 %v3797_v25 }
 0x357   :  { %v4098_v21 = vsel %vm2631_vm14, %v2630_v20, %v2575_v18  ;;  %3276 = vmatmul.mubr.msk.f32.vlgmr.msra.gmra.mrb[14].mxu0 %vm75_vm0, %v4067_v4 }
 0x358   :  { %3525 = vmatpush3.bf16.msra.mxu0 %v3909_v36  ;;  %3297 = vmatprep.mubr.msk.f32.mxu0 %vm3798_vm4, %v3799_v33 }
 0x359   :  { %3526 = vmatprep.subr.bf16.mxu0 %v3797_v25 }
 0x35c   :  { %3528 = vmatpush3.bf16.msra.mxu0 %v3921_v43 }
 0x35d   :  { %3535 = vmatprep.subr.bf16.mxu0 %v3797_v25 }
 0x422   :  { %v1176_v24 = vpop.f32.mrb[12].mxu0  ;;  %v1246_v26 = vpop.f32.mrb[12].mxu1 }
 0x423   :  { %v1321_v28 = vrot.slane %v1176_v24, 2  ;;  %v3255_v29 = vpop.f32.mrb[13].mxu0  ;;  %v3266_v31 = vpop.f32.mrb[13].mxu1  ;;  %v1331_v32 = vrot.slane %v1246_v26, 2 }
 0x425   :  { %v1323_v34 = vadd.f32 %v1321_v28, %v3961_v54  ;;  %v1333_v37 = vadd.f32 %v1331_v32, %v3969_v63 }
 0x427   :  { %v2946_v35 = vmul.f32 -1.442695, %v1323_v34  ;;  %v2947_v41 = vmul.f32 -1.442695, %v1333_v37 }
 0x429   :  { %3638 = vpow2.f32 %v2946_v35 }
 0x42a   :  { %v1316_v38 = vpop.f32.mrb[14].mxu0  ;;  %3640 = vpow2.f32 %v2947_v41 }
 0x42b   :  { %v3277_v39 = vpop.f32.mrb[15].mxu0  ;;  %v1317_v22 = vadd.f32 %v3975_v10, %v1316_v38 }
 0x42d   :  { %v1341_v0 = vrot.slane %v1317_v22, 2  ;;  %v1601_v22 = vpop.permute.xlu0 %1600 }
 0x42e   :  { %vm1602_vm2 = vcmp.eq.s32.totalorder %v1601_v22, 1 }
 0x433   :  { %v3639_v42 = vpop.eup %3638 }
 0x434   :  { %v1327_v46 = vadd.f32 1.0, %v3639_v42  ;;  %v3641_v48 = vpop.eup %3640 }
 0x435   :  { %v1337_v51 = vadd.f32 1.0, %v3641_v48 }
 0x436   :  { %3642 = vrcp.f32 %v1327_v46 }
 0x437   :  { %3644 = vrcp.f32 %v1337_v51 }
 0x440   :  { %v3643_v53 = vpop.eup %3642 }
 0x441   :  { %v1343_v55 = vmul.f32 %v3643_v53, %v1341_v0  ;;  %v3645_v63 = vpop.eup %3644 }
 0x442   :  { %v1346_v57 = vsub.f32 1.0, %v3645_v63  ;;  %v1350_v61 = vmul.f32 %v3645_v63, %v1348_v56 }
 0x443   :  { %v1344_v54 = vadd.f32 %v1343_v55, %v3978_v14 }
 0x445   :  { %3646 = vtanh.f32 %v1344_v54 }
 0x44f   :  { %v3647_v59 = vpop.eup %3646 }
 0x450   :  { %v1347_v60 = vmul.f32 %v3647_v59, %v1346_v57 }
 0x452   :  { %v1351_v62 = vadd.f32 %v1350_v61, %v1347_v60 }
 0x454   :  { %v1359_v3 = vrot.slane %v1351_v62, 6 }
 0x456   :  { %v1361_v5 = vsel %vm1357_vm15, %v1359_v3, %v4067_v4  ;;  %v1362_v6 = vsel %vm1357_vm15, %v1359_v3, 0.0 }
 0x457   :  { %3287 = vmatmul.mubr.msk.f32.vlgmr.msra.gmra.mrb[14].mxu1 %vm75_vm0, %v1361_v5  ;;  %v2450_v27 = vrot.slane %v1362_v6, %v4055_v49  ;;  %3298 = vmatmul.mubr.msk.f32.vlgmr.msra.gmra.mrb[16].mxu0 %vm75_vm0, %v1361_v5 }
 0x458   :  { %3531 = vmatpush3.bf16.msra.mxu1 %v3916_v40  ;;  %3308 = vmatprep.mubr.msk.f32.mxu1 %vm3798_vm4, %v3799_v33 }
 0x459   :  { %v2451_v14 = vcombine.high %v2450_v27, %v2450_v27  ;;  %v2458_v7 = vrot.slane %v2450_v27, %v4055_v49  ;;  %3532 = vmatprep.subr.bf16.mxu1 %v3797_v25  ;;  %3537 = vmatpush3.bf16.msra.mxu0 %v3892_v23 }
 0x45a   :  { %3538 = vmatprep.subr.bf16.mxu0 %v3797_v25  ;;  %3319 = vmatprep.mubr.msk.f32.mxu0 %vm3798_vm4, %v3799_v33 }
 0x45b   :  { %v2465_v4 = vrot.slane %v2451_v14, %v4055_v49  ;;  %v2581_v8 = vrot.slane %v2458_v7, %v4063_v1 }
 0x45c   :  { %3534 = vmatpush3.bf16.msra.mxu1 %v3928_v45 }
 0x45d   :  { %3541 = vmatprep.subr.bf16.mxu1 %v3797_v25  ;;  %3540 = vmatpush3.bf16.msra.mxu0 %v3902_v30  ;;  %v2635_v9 = vsel %vm2634_vm1, %v4092_v19, %v2581_v8  ;;  %v2585_v11 = vrot.slane %v2465_v4, %v4063_v1 }
 0x45e   :  { %3547 = vmatprep.subr.bf16.mxu0 %v3797_v25 }
 0x45f   :  { %3309 = vmatmul.mubr.msk.f32.vlgmr.msra.gmra.mrb[16].mxu1 %vm75_vm0, %v1361_v5  ;;  %v2636_v12 = vsel %vm2634_vm1, %v4098_v21, %v2585_v11 }
 0x460   :  { %3543 = vmatpush3.bf16.msra.mxu1 %v3909_v36  ;;  %3330 = vmatprep.mubr.msk.f32.mxu1 %vm3798_vm4, %v3799_v33 }
 0x461   :  { %3544 = vmatprep.subr.bf16.mxu1 %v3797_v25 }
 0x464   :  { %3546 = vmatpush3.bf16.msra.mxu1 %v3921_v43 }
 0x465   :  { %3553 = vmatprep.subr.bf16.mxu1 %v3797_v25 }
 0x52a   :  { %v1432_v13 = vpop.f32.mrb[14].mxu1  ;;  %v1502_v15 = vpop.f32.mrb[16].mxu0 }
 0x52b   :  { %v1576_v16 = vadd.f32 %v1432_v13, %v3957_v50  ;;  %v3288_v17 = vpop.f32.mrb[15].mxu1  ;;  %v3299_v18 = vpop.f32.mrb[17].mxu0  ;;  %v1583_v20 = vadd.f32 %v1502_v15, %v3959_v52 }
 0x52d   :  { %v2951_v19 = vmul.f32 -1.442695, %v1576_v16  ;;  %v2952_v21 = vmul.f32 -1.442695, %v1583_v20 }
 0x52f   :  { %3648 = vpow2.f32 %v2951_v19 }
 0x530   :  { %3650 = vpow2.f32 %v2952_v21 }
 0x532   :  { %v1572_v24 = vpop.f32.mrb[16].mxu1 }
 0x533   :  { %v3310_v26 = vpop.f32.mrb[17].mxu1  ;;  %v1573_v34 = vadd.f32 %v3975_v10, %v1572_v24 }
 0x539   :  { %v3649_v28 = vpop.eup %3648 }
 0x53a   :  { %v1580_v29 = vadd.f32 1.0, %v3649_v28  ;;  %v3651_v31 = vpop.eup %3650 }
 0x53b   :  { %v1587_v32 = vadd.f32 1.0, %v3651_v31 }
 0x53c   :  { %3652 = vrcp.f32 %v1580_v29 }
 0x53d   :  { %3654 = vrcp.f32 %v1587_v32 }
 0x546   :  { %v3653_v35 = vpop.eup %3652 }
 0x547   :  { %v1590_v37 = vmul.f32 %v3653_v35, %v1573_v34  ;;  %v3655_v39 = vpop.eup %3654  ;;  %v1854_v35 = vpop.permute.xlu1 %1853 }
 0x548   :  { %v1593_v41 = vsub.f32 1.0, %v3655_v39  ;;  %v1595_v48 = vmul.f32 %v3655_v39, %v1361_v5  ;;  %vm1855_vm5 = vcmp.eq.s32.totalorder %v1854_v35, 1 }
 0x549   :  { %v1591_v38 = vadd.f32 %v1590_v37, %v3966_v58 }
 0x54b   :  { %3656 = vtanh.f32 %v1591_v38 }
 0x555   :  { %v3657_v42 = vpop.eup %3656 }
 0x556   :  { %v1594_v46 = vmul.f32 %v3657_v42, %v1593_v41 }
 0x558   :  { %v1596_v51 = vadd.f32 %v1595_v48, %v1594_v46 }
 0x55a   :  { %v4146_v0 = vsel %vm1602_vm2, %v1596_v51, %v1361_v5  ;;  %v1604_v53 = vsel %vm1602_vm2, %v1596_v51, 0.0 }
 0x55b   :  { %3320 = vmatmul.mubr.msk.f32.vlgmr.msra.gmra.mrb[18].mxu0 %vm75_vm0, %v4146_v0  ;;  %v2473_v55 = vrot.slane %v1604_v53, %v4055_v49  ;;  %3331 = vmatmul.mubr.msk.f32.vlgmr.msra.gmra.mrb[18].mxu1 %vm75_vm0, %v4146_v0  ;;  %v1846_v26 = vrot.slane %v4146_v0, 6 }
 0x55c   :  { %3549 = vmatpush3.bf16.msra.mxu0 %v3916_v40  ;;  %3341 = vmatprep.mubr.msk.f32.mxu0 %vm3798_vm4, %v3799_v33 }
 0x55d   :  { %v2474_v54 = vcombine.high %v2473_v55, %v2473_v55  ;;  %v2481_v63 = vrot.slane %v2473_v55, %v4055_v49  ;;  %3550 = vmatprep.subr.bf16.mxu0 %v3797_v25  ;;  %3555 = vmatpush3.bf16.msra.mxu1 %v3892_v23 }
 0x55e   :  { %3556 = vmatprep.subr.bf16.mxu1 %v3797_v25  ;;  %3352 = vmatprep.mubr.msk.f32.mxu1 %vm3798_vm4, %v3799_v33 }
 0x55f   :  { %v2591_v56 = vrot.slane %v2481_v63, %v4063_v1  ;;  %v2488_v57 = vrot.slane %v2474_v54, %v4055_v49 }
 0x560   :  { %3552 = vmatpush3.bf16.msra.mxu0 %v3928_v45 }
 0x561   :  { %3559 = vmatprep.subr.bf16.mxu0 %v3797_v25  ;;  %3558 = vmatpush3.bf16.msra.mxu1 %v3902_v30  ;;  %v4167_v59 = vsel %vm2637_vm3, %v2635_v9, %v2591_v56  ;;  %v2595_v60 = vrot.slane %v2488_v57, %v4063_v1 }
 0x562   :  { %3565 = vmatprep.subr.bf16.mxu1 %v3797_v25 }
 0x563   :  { %3342 = vmatmul.mubr.msk.f32.vlgmr.msra.gmra.mrb[20].mxu0 %vm75_vm0, %v4146_v0  ;;  %v4173_v61 = vsel %vm2637_vm3, %v2636_v12, %v2595_v60 }
 0x564   :  { %3561 = vmatpush3.bf16.msra.mxu0 %v3909_v36  ;;  %3363 = vmatprep.mubr.msk.f32.mxu0 %vm3798_vm4, %v3799_v33 }
 0x565   :  { %3562 = vmatprep.subr.bf16.mxu0 %v3797_v25 }
 0x568   :  { %3564 = vmatpush3.bf16.msra.mxu0 %v3921_v43 }
 0x569   :  { %3571 = vmatprep.subr.bf16.mxu0 %v3797_v25 }
 0x62e   :  { %v1674_v62 = vpop.f32.mrb[18].mxu0  ;;  %v1744_v2 = vpop.f32.mrb[18].mxu1 }
 0x62f   :  { %v1819_v3 = vrot.slane %v1674_v62, 6  ;;  %v3321_v5 = vpop.f32.mrb[19].mxu0  ;;  %v3332_v6 = vpop.f32.mrb[19].mxu1  ;;  %v1829_v27 = vrot.slane %v1744_v2, 6 }
 0x631   :  { %v1821_v14 = vadd.f32 %v1819_v3, %v3957_v50  ;;  %v1831_v4 = vadd.f32 %v1829_v27, %v3959_v52 }
 0x633   :  { %v2956_v7 = vmul.f32 -1.442695, %v1821_v14  ;;  %v2957_v11 = vmul.f32 -1.442695, %v1831_v4 }
 0x635   :  { %3658 = vpow2.f32 %v2956_v7 }
 0x636   :  { %v1814_v8 = vpop.f32.mrb[20].mxu0  ;;  %3660 = vpow2.f32 %v2957_v11 }
 0x637   :  { %v3343_v9 = vpop.f32.mrb[21].mxu0  ;;  %v1815_v16 = vadd.f32 %v3975_v10, %v1814_v8 }
 0x639   :  { %v1839_v18 = vrot.slane %v1815_v16, 6  ;;  %v2110_v16 = vpop.permute.xlu0 %2109 }
 0x63a   :  { %vm2111_vm7 = vcmp.eq.s32.totalorder %v2110_v16, 1 }
 0x63f   :  { %v3659_v12 = vpop.eup %3658 }
 0x640   :  { %v1825_v13 = vadd.f32 1.0, %v3659_v12  ;;  %v3661_v15 = vpop.eup %3660 }
 0x641   :  { %v1835_v17 = vadd.f32 1.0, %v3661_v15 }
 0x642   :  { %3662 = vrcp.f32 %v1825_v13 }
 0x643   :  { %3664 = vrcp.f32 %v1835_v17 }
 0x64c   :  { %v3663_v19 = vpop.eup %3662 }
 0x64d   :  { %v1841_v20 = vmul.f32 %v3663_v19, %v1839_v18  ;;  %v3665_v24 = vpop.eup %3664 }
 0x64e   :  { %v1844_v28 = vsub.f32 1.0, %v3665_v24  ;;  %v1848_v32 = vmul.f32 %v3665_v24, %v1846_v26 }
 0x64f   :  { %v1842_v21 = vadd.f32 %v1841_v20, %v3966_v58 }
 0x651   :  { %3666 = vtanh.f32 %v1842_v21 }
 0x65b   :  { %v3667_v29 = vpop.eup %3666 }
 0x65c   :  { %v1845_v31 = vmul.f32 %v3667_v29, %v1844_v28 }
 0x65e   :  { %v1849_v34 = vadd.f32 %v1848_v32, %v1845_v31 }
 0x660   :  { %v1857_v37 = vrot.slane %v1849_v34, 2 }
 0x662   :  { %v4187_v38 = vsel %vm1855_vm5, %v1857_v37, %v4146_v0  ;;  %v1860_v39 = vsel %vm1855_vm5, %v1857_v37, 0.0 }
 0x663   :  { %3353 = vmatmul.mubr.msk.f32.vlgmr.msra.gmra.mrb[20].mxu1 %vm75_vm0, %v4187_v38  ;;  %v2496_v41 = vrot.slane %v1860_v39, %v4055_v49  ;;  %3364 = vmatmul.mubr.msk.f32.vlgmr.msra.gmra.mrb[22].mxu0 %vm75_vm0, %v4187_v38  ;;  %v2102_v9 = vrot.slane %v4187_v38, 4 }
 0x664   :  { %3567 = vmatpush3.bf16.msra.mxu1 %v3916_v40  ;;  %3374 = vmatprep.mubr.msk.f32.mxu1 %vm3798_vm4, %v3799_v33 }
 0x665   :  { %v2497_v42 = vcombine.high %v2496_v41, %v2496_v41  ;;  %3568 = vmatprep.subr.bf16.mxu1 %v3797_v25  ;;  %3573 = vmatpush3.bf16.msra.mxu0 %v3892_v23  ;;  %v2504_v46 = vrot.slane %v2496_v41, %v4055_v49 }
 0x666   :  { %3574 = vmatprep.subr.bf16.mxu0 %v3797_v25  ;;  %3385 = vmatprep.mubr.msk.f32.mxu0 %vm3798_vm4, %v3799_v33 }
 0x667   :  { %v2601_v48 = vrot.slane %v2504_v46, %v4063_v1  ;;  %v2511_v22 = vrot.slane %v2497_v42, %v4055_v49 }
 0x668   :  { %3570 = vmatpush3.bf16.msra.mxu1 %v3928_v45 }
 0x669   :  { %3577 = vmatprep.subr.bf16.mxu1 %v3797_v25  ;;  %3576 = vmatpush3.bf16.msra.mxu0 %v3902_v30  ;;  %v2641_v23 = vsel %vm2640_vm6, %v4167_v59, %v2601_v48  ;;  %v2605_v51 = vrot.slane %v2511_v22, %v4063_v1 }
 0x66a   :  { %3583 = vmatprep.subr.bf16.mxu0 %v3797_v25 }
 0x66b   :  { %3375 = vmatmul.mubr.msk.f32.vlgmr.msra.gmra.mrb[22].mxu1 %vm75_vm0, %v4187_v38  ;;  %v2642_v0 = vsel %vm2640_vm6, %v4173_v61, %v2605_v51 }
 0x66c   :  { %3579 = vmatpush3.bf16.msra.mxu1 %v3909_v36  ;;  %3396 = vmatprep.mubr.msk.f32.mxu1 %vm3798_vm4, %v3799_v33 }
 0x66d   :  { %3580 = vmatprep.subr.bf16.mxu1 %v3797_v25 }
 0x670   :  { %3582 = vmatpush3.bf16.msra.mxu1 %v3921_v43 }
 0x671   :  { %3589 = vmatprep.subr.bf16.mxu1 %v3797_v25 }
 0x736   :  { %v1930_v30 = vpop.f32.mrb[20].mxu1  ;;  %v2000_v53 = vpop.f32.mrb[22].mxu0 }
 0x737   :  { %v2075_v55 = vrot.slane %v1930_v30, 4  ;;  %v3354_v54 = vpop.f32.mrb[21].mxu1  ;;  %v3365_v63 = vpop.f32.mrb[23].mxu0  ;;  %v2085_v56 = vrot.slane %v2000_v53, 4 }
 0x739   :  { %v2077_v57 = vadd.f32 %v2075_v55, %v3957_v50  ;;  %v2087_v36 = vadd.f32 %v2085_v56, %v3959_v52 }
 0x73b   :  { %v2961_v59 = vmul.f32 -1.442695, %v2077_v57  ;;  %v2962_v62 = vmul.f32 -1.442695, %v2087_v36 }
 0x73d   :  { %3668 = vpow2.f32 %v2961_v59 }
 0x73e   :  { %v2070_v60 = vpop.f32.mrb[22].mxu1  ;;  %3670 = vpow2.f32 %v2962_v62 }
 0x73f   :  { %v3376_v61 = vpop.f32.mrb[23].mxu1  ;;  %v2071_v5 = vadd.f32 %v3975_v10, %v2070_v60 }
 0x740   :  { %v2366_v61 = vpop.permute.xlu1 %2365 }
 0x741   :  { %v2095_v27 = vrot.slane %v2071_v5, 4 }
 0x747   :  { %v3669_v2 = vpop.eup %3668 }
 0x748   :  { %v2081_v43 = vadd.f32 1.0, %v3669_v2  ;;  %v3671_v3 = vpop.eup %3670 }
 0x749   :  { %v2091_v6 = vadd.f32 1.0, %v3671_v3 }
 0x74a   :  { %3672 = vrcp.f32 %v2081_v43 }
 0x74b   :  { %3674 = vrcp.f32 %v2091_v6 }
 0x754   :  { %v3673_v14 = vpop.eup %3672 }
 0x755   :  { %v2097_v7 = vmul.f32 %v3673_v14, %v2095_v27  ;;  %v3675_v8 = vpop.eup %3674 }
 0x756   :  { %v2100_v11 = vsub.f32 1.0, %v3675_v8  ;;  %v2104_v15 = vmul.f32 %v3675_v8, %v2102_v9 }
 0x757   :  { %v2098_v4 = vadd.f32 %v2097_v7, %v3966_v58 }
 0x759   :  { %3676 = vtanh.f32 %v2098_v4 }
 0x763   :  { %v3677_v12 = vpop.eup %3676 }
 0x764   :  { %v2101_v13 = vmul.f32 %v3677_v12, %v2100_v11 }
 0x766   :  { %v2105_v17 = vadd.f32 %v2104_v15, %v2101_v13 }
 0x768   :  { %v2113_v18 = vrot.slane %v2105_v17, 4 }
 0x76a   :  { %v2115_v19 = vsel %vm2111_vm7, %v2113_v18, %v4187_v38  ;;  %v2116_v20 = vsel %vm2111_vm7, %v2113_v18, 0.0 }
 0x76b   :  { %3386 = vmatmul.mubr.msk.f32.vlgmr.msra.gmra.mrb[24].mxu0 %vm75_vm0, %v2115_v19  ;;  %v2519_v21 = vrot.slane %v2116_v20, %v4055_v49  ;;  %3397 = vmatmul.mubr.msk.f32.vlgmr.msra.gmra.mrb[24].mxu1 %vm75_vm0, %v2115_v19  ;;  %v2358_v56 = vrot.slane %v2115_v19, 2 }
 0x76c   :  { %3585 = vmatpush3.bf16.msra.mxu0 %v3916_v40  ;;  %3407 = vmatprep.mubr.msk.f32.mxu0 %vm3798_vm4, %v3799_v33 }
 0x76d   :  { %3586 = vmatprep.subr.bf16.mxu0 %v3797_v25  ;;  %v2527_v24 = vrot.slane %v2519_v21, %v4055_v49  ;;  %v2520_v26 = vcombine.high %v2519_v21, %v2519_v21  ;;  %3418 = vmatprep.mubr.msk.f32.mxu1 %vm3798_vm4, %v3799_v33  ;;  %vm2367_vm4 = vcmp.eq.s32.totalorder %v2366_v61, 1 }
 0x76f   :  { %v2611_v28 = vrot.slane %v2527_v24, %v4063_v1  ;;  %v2534_v29 = vrot.slane %v2520_v26, %v4055_v49 }
 0x770   :  { %3588 = vmatpush3.bf16.msra.mxu0 %v3928_v45 }
 0x771   :  { %v2644_v31 = vsel %vm2643_vm8, %v2641_v23, %v2611_v28  ;;  %v2615_v40 = vrot.slane %v2534_v29, %v4063_v1 }
 0x773   :  { %3408 = vmatmul.mubr.msk.f32.vlgmr.msra.gmra.mrb[26].mxu0 %vm75_vm0, %v2115_v19  ;;  %v2645_v32 = vsel %vm2643_vm8, %v2642_v0, %v2615_v40 }
 0x83e   :  { %v2186_v34 = vpop.f32.mrb[24].mxu0  ;;  %v2256_v35 = vpop.f32.mrb[24].mxu1 }
 0x83f   :  { %v2331_v37 = vrot.slane %v2186_v34, 2  ;;  %v3387_v38 = vpop.f32.mrb[25].mxu0  ;;  %v3398_v39 = vpop.f32.mrb[25].mxu1  ;;  %v2341_v41 = vrot.slane %v2256_v35, 2 }
 0x841   :  { %v2333_v33 = vadd.f32 %v2331_v37, %v3957_v50  ;;  %v2343_v46 = vadd.f32 %v2341_v41, %v3959_v52 }
 0x843   :  { %v2966_v42 = vmul.f32 -1.442695, %v2333_v33  ;;  %v2967_v22 = vmul.f32 -1.442695, %v2343_v46 }
 0x845   :  { %3678 = vpow2.f32 %v2966_v42 }
 0x846   :  { %v2326_v48 = vpop.f32.mrb[26].mxu0  ;;  %3680 = vpow2.f32 %v2967_v22 }
 0x847   :  { %v3409_v45 = vpop.f32.mrb[27].mxu0  ;;  %v2327_v30 = vadd.f32 %v3975_v10, %v2326_v48 }
 0x849   :  { %v2351_v55 = vrot.slane %v2327_v30, 2 }
 0x84f   :  { %v3679_v23 = vpop.eup %3678 }
 0x850   :  { %v2337_v51 = vadd.f32 1.0, %v3679_v23  ;;  %v3681_v0 = vpop.eup %3680 }
 0x851   :  { %v2347_v53 = vadd.f32 1.0, %v3681_v0 }
 0x852   :  { %3682 = vrcp.f32 %v2337_v51 }
 0x853   :  { %3684 = vrcp.f32 %v2347_v53 }
 0x85c   :  { %v3683_v54 = vpop.eup %3682 }
 0x85d   :  { %v2353_v63 = vmul.f32 %v3683_v54, %v2351_v55  ;;  %v3685_v52 = vpop.eup %3684 }
 0x85e   :  { %v2356_v57 = vsub.f32 1.0, %v3685_v52  ;;  %v2360_v60 = vmul.f32 %v3685_v52, %v2358_v56  ;;  %v2790_v52 = vld [vmem:[%s4334_s6] sm:$0xff]  ;;  %v2791_v56 = vld [vmem:[%s4334_s6 + $0x8] sm:$0xff] }
 0x85f   :  { %v2354_v50 = vadd.f32 %v2353_v63, %v3966_v58 }
 0x861   :  { %3686 = vtanh.f32 %v2354_v50 }
 0x86b   :  { %v3687_v59 = vpop.eup %3686 }
 0x86c   :  { %v2357_v36 = vmul.f32 %v3687_v59, %v2356_v57  ;;  %v3590_v57 = vpack.c.bf16 %v2791_v56, %v2790_v52  ;;  %v2793_v59 = vld [vmem:[%s4334_s6 + $0x18] sm:$0xff] }
 0x86e   :  { %v2361_v62 = vadd.f32 %v2360_v60, %v2357_v36  ;;  %3591 = vmatpush3.bf16.msra.mxu1 %v3590_v57 }
 0x86f   :  { %3592 = vmatprep.subr.bf16.mxu1 %v3797_v25 }
 0x870   :  { %v2369_v2 = vrot.slane %v2361_v62, 6 }
 0x872   :  { %v2371_v43 = vsel %vm2367_vm4, %v2369_v2, %v2115_v19  ;;  %v2372_v10 = vsel %vm2367_vm4, %v2369_v2, 0.0 }
 0x873   :  { %v2542_v3 = vrot.slane %v2372_v10, %v4055_v49  ;;  %v2656_v5 = vrot.slane %v2371_v43, %v4055_v49 }
 0x875   :  { %v2550_v6 = vrot.slane %v2542_v3, %v4055_v49  ;;  %v2664_v58 = vrot.slane %v2656_v5, %v4055_v49  ;;  %v2543_v27 = vcombine.high %v2542_v3, %v2542_v3  ;;  %v2657_v14 = vcombine.high %v2656_v5, %v2656_v5 }
 0x877   :  { %v2621_v7 = vrot.slane %v2550_v6, %v4063_v1  ;;  %v2675_v4 = vrot.slane %v2664_v58, %v4063_v1  ;;  %v2557_v8 = vrot.slane %v2543_v27, %v4055_v49  ;;  %v2671_v9 = vrot.slane %v2657_v14, %v4055_v49 }
 0x878   :  { %v2695_v49 = vand.u32 127, %v2376_v44  ;;  %v2718_v44 = vsub.s32 1, %v4052_v47 }
 0x879   :  { %v4253_v11 = vsel %vm2646_vm9, %v2644_v31, %v2621_v7  ;;  %v2625_v12 = vrot.slane %v2557_v8, %v4063_v1  ;;  %v2679_v13 = vrot.slane %v2671_v9, %v4063_v1 }
 0x87a   :  { %v2682_v15 = vmul.f32 %v2675_v4, %v4253_v11  ;;  %v4265_v21 = vsub.s32 %v2695_v49, %v4052_v47 }
 0x87b   :  { %v4258_v16 = vsel %vm2646_vm9, %v2645_v32, %v2625_v12 }
 0x87c   :  { %v2684_v17 = vsel %vm75_vm0, %v2682_v15, 0.0  ;;  %v2683_v18 = vmul.f32 %v2679_v13, %v4258_v16 }
 0x87d   :  { %2685 = vadd.xlane.f32.xlu0 %v2684_v17 }
 0x87e   :  { %v2687_v19 = vsel %vm75_vm0, %v2683_v18, 0.0 }
 0x87f   :  { %2688 = vadd.xlane.f32.xlu1 %v2687_v19 }
 0x90a   :  { %v2686_v20 = vpop.xlane.xlu0 %2685 }
 0x90b   :  { %v2690_v24 = vmul.f32 0.17677669, %v2686_v20 }
 0x90c   :  { %v2689_v26 = vpop.xlane.xlu1 %2688 }
 0x90d   :  { %v2691_v28 = vmul.f32 0.17677669, %v2689_v26  ;;  %v2699_v29 = vrot.slane %v2690_v24, %v4265_v21 }
 0x90f   :  { %v2703_v31 = vrot.slane %v2691_v28, %v4265_v21 }
 0x911   :  { %v2705_v40 = vsel %vm2704_vm10, %v2703_v31, %v2699_v29 }
 0x912   :  { %v2708_v32 = vsel %vm2707_vm11, %v2705_v40, -inf }
 0x913   :  { %2709 = vmax.xlane.f32.xlu0 %v2708_v32 }
 0x9a0   :  { %v2710_v34 = vpop.xlane.xlu0 %2709 }
 0x9a1   :  { %v2715_v35 = vrot.slane %v2710_v34, %v4063_v1  ;;  %v2719_v37 = vrot.slane %v2710_v34, %v2718_v44 }
 0x9a3   :  { %v2722_v38 = vsub.f32 %v2690_v24, %v2715_v35  ;;  %v2723_v39 = vsub.f32 %v2691_v28, %v2719_v37 }
 0x9a5   :  { %v2724_v41 = vmul.f32 1.442695, %v2722_v38  ;;  %v2726_v33 = vmul.f32 1.442695, %v2723_v39 }
 0x9a7   :  { %3688 = vpow2.f32 %v2724_v41 }
 0x9a8   :  { %3690 = vpow2.f32 %v2726_v33 }
 0x9b1   :  { %v3689_v42 = vpop.eup %3688 }
 0x9b2   :  { %v3691_v46 = vpop.eup %3690  ;;  %2731 = vperm.xlu0 %3606, %v3689_v42  }
 0x9b3   :  { %2734 = vperm.xlu1 %3607, %v3691_v46  }
 0xa31   :  { %v2732_v48 = vpop.permute.xlu0 %2731 }
 0xa32   :  { %v2735_v45 = vpop.permute.xlu1 %2734  ;;  %v2739_v22 = vrot.slane %v2732_v48, %v4265_v21 }
 0xa33   :  { %v2743_v47 = vrot.slane %v2735_v45, %v4265_v21 }
 0xa35   :  { %v2744_v23 = vsel %vm2704_vm10, %v2743_v47, %v2739_v22 }
 0xa36   :  { %v2746_v51 = vsel %vm2707_vm11, %v2744_v23, 0.0 }
 0xa37   :  { %2747 = vadd.xlane.f32.xlu1 %v2746_v51 }
 0xac4   :  { %v2748_v0 = vpop.xlane.xlu1 %2747 }
 0xac5   :  { %v2753_v30 = vrot.slane %v2748_v0, %v4063_v1  ;;  %v2757_v53 = vrot.slane %v2748_v0, %v2718_v44  ;;  %v2792_v1 = vld [vmem:[%s4334_s6 + $0x10] sm:$0xff]  ;;  %s3801_s6 = smov [#allocation8]  }
 0xac6   :  { %v3593_v36 = vpack.c.bf16 %v2793_v59, %v2792_v1  ;;  %s2905_s30 = sshll.u32 %s3801_s6, 4  ;;  %s2906_s30 = int_to_ptr.vmem [resolvable:$true] %s2905_s30 }
 0xac7   :  { %3692 = vrcp.f32 %v2753_v30  ;;  %s3740_s11 = scalar_lea.vmem %s2906_s30, 32  ;;  %p3745_p3 = scmp.lt.s32.totalorder %s2906_s30, %s2906_s30 }
 0xac8   :  { %3694 = vrcp.f32 %v2757_v53  ;;  %3594 = vmatpush3.bf16.msra.mxu1 %v3593_v36  ;;  %p3741_p2 = scmp.ne.s32.totalorder %s2906_s30, %s3740_s11  ;;  %p3746_p4 = scmp.lt.s32.totalorder %s3740_s11, %s3740_s11 }
 0xaca   :  { %p3747_p5 = por %p3746_p4, %p3745_p3 }
 0xacc   :  { %p3748_p6 = pnand %p3747_p5, %p3741_p2 }
 0xad1   :  { %v3693_v55 = vpop.eup %3692 }
 0xad2   :  { %v2761_v54 = vmul.f32 %v3693_v55, %v3689_v42  ;;  %v3695_v63 = vpop.eup %3694 }
 0xad3   :  { %v2763_v50 = vmul.f32 %v3695_v63, %v3691_v46 }
 0xad4   :  { %2766 = vperm.xlu0 %3606, %v2761_v54  }
 0xad8   :  { %2771 = vperm.xlu0 %3606, %v2763_v50  }
 0xb53   :  { %v2767_v60 = vpop.permute.xlu0 %2766 }
 0xb54   :  { %v2774_v61 = vmul.f32 %v2767_v60, %v4253_v11  ;;  %v2881_v10 = vrot.slane %v2767_v60, %v4265_v21 }
 0xb56   :  { %v2776_v62 = vsel %vm75_vm0, %v2774_v61, 0.0 }
 0xb57   :  { %v2777_v2 = vrot.slane %v2776_v62, 4  ;;  %v2772_v43 = vpop.permute.xlu0 %2771 }
 0xb58   :  { %v2775_v25 = vmul.f32 %v2772_v43, %v4258_v16  ;;  %v2885_v3 = vrot.slane %v2772_v43, %v4265_v21 }
 0xb59   :  { %v2778_v5 = vadd.f32 %v2777_v2, %v2776_v62 }
 0xb5a   :  { %v2783_v6 = vsel %vm75_vm0, %v2775_v25, 0.0  ;;  %v2886_v58 = vsel %vm2704_vm10, %v2885_v3, %v2881_v10 }
 0xb5b   :  { %v2779_v27 = vrot.slane %v2778_v5, 2  ;;  %v2784_v14 = vrot.slane %v2783_v6, 4  ;;  %2888 = vst.msk [vmem:[#allocation8] sm:$0x3] %vm2707_vm11, %v2886_v58 }
 0xb5d   :  { %v2780_v7 = vadd.f32 %v2779_v27, %v2778_v5  ;;  %v2785_v4 = vadd.f32 %v2784_v14, %v2783_v6 }
 0xb5f   :  { %v2786_v8 = vrot.slane %v2785_v4, 2  ;;  %v2781_v9 = vrot.slane %v2780_v7, 1 }
 0xb61   :  { %v2787_v11 = vadd.f32 %v2786_v8, %v2785_v4  ;;  %v2782_v13 = vadd.f32 %v2781_v9, %v2780_v7 }
 0xb63   :  { %v2788_v12 = vrot.slane %v2787_v11, 1 }
 0xb65   :  { %v2789_v15 = vadd.f32 %v2788_v12, %v2787_v11 }
 0xb67   :  { %v2803_v16 = vsel %vm2704_vm10, %v2789_v15, %v2782_v13 }
 0xb68   :  { %3419 = vmatmul.mubr.msk.f32.vlgmr.msra.gmra.mrb[26].mxu1 %vm75_vm0, %v2803_v16 }
 0xb69   :  { %3751 = shalt.err (!%p3748_p6)
}
 0xb6a   :  { %s3752_s10 = scalar_lea.hbm %s4337_s9, 32 }
 0xb6b   :  { %p3753_p7 = scmp.ne.s32.totalorder %s4337_s9, %s3752_s10  ;;  %p3756_p8 = scmp.lt.u32.totalorder %s3752_s10, %s4337_s9 }
 0xb6d   :  { %p3758_p9 = pnand %p3756_p8, %p3753_p7 }
 0xb6f   :  { %3761 = shalt.err (!%p3758_p9)
}
 0xb70   :  { %2908 = dma.vmem_to_hbm [thread:$0]  %s2906_s30, 32, %s4337_s9, [#allocation9]   ;;  %v2968_v17 = vld [vmem:[%s4335_s7] ss:$0 sm:$0xff]  ;;  %vm2876_vm0 = vcmask 25600  }
 0xb71   :  { %s3802_s18 = smov [#allocation7]  }
 0xb72   :  { %s2895_s19 = sshll.u32 %s3802_s18, 4  ;;  %s2896_s19 = int_to_ptr.vmem [resolvable:$true] %s2895_s19 }
 0xb73   :  { %s3762_s20 = scalar_lea.vmem %s2896_s19, 32  ;;  %p3767_p11 = scmp.lt.s32.totalorder %s2896_s19, %s2896_s19 }
 0xb74   :  { %p3763_p10 = scmp.ne.s32.totalorder %s2896_s19, %s3762_s20  ;;  %p3768_p12 = scmp.lt.s32.totalorder %s3762_s20, %s3762_s20 }
 0xb76   :  { %p3769_p13 = por %p3768_p12, %p3767_p11 }
 0xb78   :  { %p3770_p0 = pnand %p3769_p13, %p3763_p10 }
 0xc3b   :  { %v2872_v18 = vpop.f32.mrb[26].mxu1 }
 0xc3c   :  { %v2873_v19 = vadd.f32 %v2968_v17, %v2872_v18  ;;  %v3420_v49 = vpop.f32.mrb[27].mxu1 }
 0xc3e   :  { %2877 = vst.msk [vmem:[#allocation7] sm:$0x3] %vm2876_vm0, %v2873_v19 }
 0xc3f   :  { %3773 = shalt.err (!%p3770_p0)
}
 0xc40   :  { %s3774_s4 = scalar_lea.hbm %s4336_s8, 32 }
 0xc41   :  { %p3775_p1 = scmp.ne.s32.totalorder %s4336_s8, %s3774_s4  ;;  %p3778_p2 = scmp.lt.u32.totalorder %s3774_s4, %s4336_s8 }
 0xc43   :  { %p3780_p3 = pnand %p3778_p2, %p3775_p1 }
 0xc45   :  { %3783 = shalt.err (!%p3780_p3)
}
 0xc46   :  { %2898 = dma.vmem_to_hbm [thread:$0]  %s2896_s19, 32, %s4336_s8, [#allocation4]  }
 0xc47   :  { %3788 = dma.done.wait [#allocation4], 32  }
 0xc48   :  { %3789 = vsyncadd [#allocation4], 4294967264 }
 0xc49   :  { %3790 = dma.done.wait [#allocation9], 32  }
 0xc4a   :  { %3791 = vsyncadd [#allocation9], 4294967264 }
 0xc4b   :  { %2915 = vsyncpa [#allocation3], 1 }
 0xc4c   :  { %2916 = vsyncpa [#allocation6], 1 }
 0xc4d   :  { %2917 = vsyncpa [#allocation4], 1 }
 0xc4e   :  { %2918 = vsyncpa [#allocation9], 1 }

</bundles_post_ra>
